<compile_context>
chip_gen: v6e
topology: v6e:2x2x1
jax: 0.10.0
libtpu: 0.0.40
codegen_flags: <defaults>
</compile_context>

<pallas_src>
import math
import numpy as np
import jax
import jax.numpy as jnp
from jax import lax
from jax.experimental import pallas as pl
from jax.experimental.pallas import tpu as pltpu

# ---------------- small config consistent with the module ----------------
NUM_LAYERS = 2
N_POSTS    = 8       # n_posts (sequence length of repeated posts)
H_HID      = 32      # h_hid
N_HEAD     = 4       # n_head
E_HID      = 64      # e_hid (FFN hidden)
C_IN       = 16      # c_in (output feature dim of the final Linear)
BATCH      = 2
HEAD_DIM   = H_HID // N_HEAD
LN_EPS     = 1e-5
NEG_BIG    = 1e9

# ---------------- packed-slab layout (all offsets static) ------------------
LANES        = 128
ROWS_W_LAYER = H_HID + H_HID + H_HID + E_HID      # wqkv | wo | w1 | w2  = 160 rows
ROW_WFC      = NUM_LAYERS * ROWS_W_LAYER          # 320
ROWS_W       = ROW_WFC + H_HID                    # 352

ROWS_V_LAYER = 8                                  # bqkv,bo,g1,be1,b1,b2,g2,be2
ROW_BFC      = NUM_LAYERS * ROWS_V_LAYER          # 16
ROW_HMASK    = ROW_BFC + 1                        # 17..17+NH-1
ROW_AINV     = 24                                 # 24..24+P-1
ROWS_V       = 32


# =====================  fused forward kernel ================================
def _layer_norm(x, g, b):
    mu = jnp.mean(x, axis=-1, keepdims=True)
    xc = x - mu
    var = jnp.mean(xc * xc, axis=-1, keepdims=True)
    return xc * lax.rsqrt(var + LN_EPS) * g + b


def _fused_kernel(xsum_ref, mask_col_ref, mask_row_ref, w_ref, v_ref, out_ref):
    # xsum_ref: (B,1,H)   mask_col_ref: (B,P,1)   mask_row_ref: (B,1,P)
    # w_ref:    (ROWS_W, 128) packed weight slab
    # v_ref:    (ROWS_V, 128) packed vector slab (biases / LN / head masks / ainv)
    B, P, _ = mask_col_ref.shape
    H, E, C = H_HID, E_HID, C_IN
    NH, HD = N_HEAD, HEAD_DIM

    mask_col = mask_col_ref[...]                                   # (B,P,1)
    ainv = v_ref[ROW_AINV:ROW_AINV + P, 0:1]                       # (P,1)

    # repeat + keep-only-listed-rows + attn_inverse scaling, fused:
    coef = mask_col * ainv                                         # (B,P,1)
    x = (coef * xsum_ref[...]).reshape(B * P, H)                   # (B*P,H)

    # key-padding bias, hoisted out of the layer loop (shared by both layers)
    key_bias = (mask_row_ref[...] - 1.0) * NEG_BIG                 # (B,1,P)

    # precomputed per-head lane masks (constant, from the vector slab)
    hmasks = [v_ref[ROW_HMASK + h:ROW_HMASK + h + 1, 0:H].reshape(1, 1, H)
              for h in range(NH)]

    for l in range(NUM_LAYERS):
        rb = l * ROWS_W_LAYER
        vb = l * ROWS_V_LAYER
        wqkv = w_ref[rb:rb + H, 0:3 * H]                  # (H,3H) (Q cols pre-scaled)
        wo   = w_ref[rb + H:rb + 2 * H, 0:H]
        w1   = w_ref[rb + 2 * H:rb + 3 * H, 0:E]
        w2   = w_ref[rb + 3 * H:rb + 3 * H + E, 0:H]
        bqkv = v_ref[vb + 0:vb + 1, 0:3 * H]
        bo   = v_ref[vb + 1:vb + 2, 0:H]
        g1   = v_ref[vb + 2:vb + 3, 0:H]
        be1  = v_ref[vb + 3:vb + 4, 0:H]
        b1   = v_ref[vb + 4:vb + 5, 0:E]
        b2   = v_ref[vb + 5:vb + 6, 0:H]
        g2   = v_ref[vb + 6:vb + 7, 0:H]
        be2  = v_ref[vb + 7:vb + 8, 0:H]

        # packed QKV projection on the whole (B*P, H) slab
        qkv = jnp.dot(x, wqkv, preferred_element_type=jnp.float32) + bqkv  # (B*P,3H)
        q3 = qkv[:, 0:H].reshape(B, P, H)           # Q already carries 1/sqrt(HD)
        k3 = qkv[:, H:2 * H].reshape(B, P, H)
        v3 = qkv[:, 2 * H:3 * H].reshape(B, P, H)

        # per-head attention via lane masking: no head fold, no relayouts.
        head_outs = []
        for h in range(NH):
            hm = hmasks[h]
            s = jnp.einsum('bqc,bkc->bqk', q3, k3 * hm,
                           preferred_element_type=jnp.float32) + key_bias  # (B,P,P)
            s = s - jnp.max(s, axis=-1, keepdims=True)
            p = jnp.exp(s)
            p = p * pl.reciprocal(jnp.sum(p, axis=-1, keepdims=True), approx=False)
            head_outs.append(jnp.einsum('bqk,bkc->bqc', p, v3 * hm,
                                        preferred_element_type=jnp.float32))
        attn = (head_outs[0] + head_outs[1]) + (head_outs[2] + head_outs[3])
        attn = attn.reshape(B * P, H)

        a = jnp.dot(attn, wo, preferred_element_type=jnp.float32) + bo
        x1 = _layer_norm(x + a, g1, be1)

        f = jnp.maximum(jnp.dot(x1, w1, preferred_element_type=jnp.float32) + b1, 0.0)
        f = jnp.dot(f, w2, preferred_element_type=jnp.float32) + b2
        x = _layer_norm(x1 + f, g2, be2)

    # final Linear(h_hid -> c_in) + keep-only-listed-rows
    wfc = w_ref[ROW_WFC:ROW_WFC + H, 0:C]
    bfc = v_ref[ROW_BFC:ROW_BFC + 1, 0:C]
    y = jnp.dot(x, wfc, preferred_element_type=jnp.float32) + bfc   # (B*P,C)
    out_ref[...] = y * mask_col.reshape(B * P, 1)


# =====================  one-time host-side parameter packing ===============
def pack_params(params):
    """Pack all weights into 2 VMEM-friendly slabs. Called ONCE at init."""
    attn_inverse, layer_params, wfc, bfc = params
    H, E, C = H_HID, E_HID, C_IN
    scale = 1.0 / math.sqrt(HEAD_DIM)

    W = np.zeros((ROWS_W, LANES), np.float32)
    V = np.zeros((ROWS_V, LANES), np.float32)

    for l, lp in enumerate(layer_params):
        (wq, bq, wk, bk, wv, bv, wo, bo, g1, be1, w1, b1, w2, b2, g2, be2) = lp
        rb = l * ROWS_W_LAYER
        W[rb:rb + H,            0:H]       = np.asarray(wq) * scale   # fold 1/sqrt(HD)
        W[rb:rb + H,            H:2 * H]   = np.asarray(wk)
        W[rb:rb + H,            2 * H:3 * H] = np.asarray(wv)
        W[rb + H:rb + 2 * H,    0:H]       = np.asarray(wo)
        W[rb + 2 * H:rb + 3 * H, 0:E]      = np.asarray(w1)
        W[rb + 3 * H:rb + 3 * H + E, 0:H]  = np.asarray(w2)

        vb = l * ROWS_V_LAYER
        V[vb + 0, 0:H]        = np.asarray(bq)[0] * scale             # fold 1/sqrt(HD)
        V[vb + 0, H:2 * H]    = np.asarray(bk)[0]
        V[vb + 0, 2 * H:3 * H] = np.asarray(bv)[0]
        V[vb + 1, 0:H] = np.asarray(bo)[0]
        V[vb + 2, 0:H] = np.asarray(g1)[0]
        V[vb + 3, 0:H] = np.asarray(be1)[0]
        V[vb + 4, 0:E] = np.asarray(b1)[0]
        V[vb + 5, 0:H] = np.asarray(b2)[0]
        V[vb + 6, 0:H] = np.asarray(g2)[0]
        V[vb + 7, 0:H] = np.asarray(be2)[0]

    W[ROW_WFC:ROW_WFC + H, 0:C] = np.asarray(wfc)
    V[ROW_BFC, 0:C] = np.asarray(bfc)[0]
    for h in range(N_HEAD):
        V[ROW_HMASK + h, h * HEAD_DIM:(h + 1) * HEAD_DIM] = 1.0
    V[ROW_AINV:ROW_AINV + N_POSTS, 0] = np.asarray(attn_inverse)[:, 0]

    return jnp.asarray(W), jnp.asarray(V)


# =====================  per-call wrapper (hot path) ==========================
def content_reconstruction(xc, xs, mask_nonzero, w_slab, v_slab):
    B = xc.shape[0]
    P, C = N_POSTS, C_IN

    bidx, ridx = mask_nonzero
    mask = jnp.zeros((B, P), jnp.float32).at[bidx, ridx].set(1.0)
    mask_col = mask[:, :, None]                         # (B,P,1)
    mask_row = mask[:, None, :]                         # (B,1,P)
    xsum = (xc + xs).astype(jnp.float32)[:, None, :]    # (B,1,H)

    vmem = pl.BlockSpec(memory_space=pltpu.MemorySpace.VMEM)
    out2d = pl.pallas_call(
        _fused_kernel,
        out_shape=jax.ShapeDtypeStruct((B * P, C), jnp.float32),
        in_specs=[vmem] * 5,
        out_specs=vmem,
    )(xsum, mask_col, mask_row, w_slab, v_slab)
    return out2d.reshape(B, P, C)


content_reconstruction = jax.jit(content_reconstruction)


# =====================  pure-JAX reference (for verification) ================
def ref_layer_norm(x, g, b):
    mu = x.mean(-1, keepdims=True)
    var = ((x - mu) ** 2).mean(-1, keepdims=True)
    return (x - mu) / jnp.sqrt(var + LN_EPS) * g + b


def ref_forward(xc, xs, mask, params):
    attn_inverse, layer_params, wfc, bfc = params
    x = (xc + xs)[:, None, :] * mask[:, :, None]
    x = x * attn_inverse[None, :, :]
    key_bias = (mask[:, None, :] - 1.0) * NEG_BIG
    for (wq, bq, wk, bk, wv, bv, wo, bo, g1, be1, w1, b1, w2, b2, g2, be2) in layer_params:
        q = x @ wq + bq
        k = x @ wk + bk
        v = x @ wv + bv
        outs = []
        for h in range(N_HEAD):
            lo = h * HEAD_DIM
            qh, kh, vh = (t[..., lo:lo + HEAD_DIM] for t in (q, k, v))
            s = jnp.einsum('bqd,bkd->bqk', qh, kh) / math.sqrt(HEAD_DIM) + key_bias
            p = jax.nn.softmax(s, axis=-1)
            outs.append(jnp.einsum('bqk,bkd->bqd', p, vh))
        a = jnp.concatenate(outs, -1) @ wo + bo
        x1 = ref_layer_norm(x + a, g1, be1)
        f = jnp.maximum(x1 @ w1 + b1, 0.0) @ w2 + b2
        x = ref_layer_norm(x1 + f, g2, be2)
    y = x @ wfc + bfc
    return y * mask[:, :, None]


# =====================  deterministic parameter init ========================
def _linear_init(key, fan_in, fan_out):
    kw, kb = jax.random.split(key)
    lim = 1.0 / math.sqrt(fan_in)
    w = jax.random.uniform(kw, (fan_in, fan_out), jnp.float32, -lim, lim)
    b = jax.random.uniform(kb, (1, fan_out), jnp.float32, -lim, lim)
    return w, b


def init_params(key):
    keys = jax.random.split(key, 2 + NUM_LAYERS)
    # nn.init.kaiming_uniform_ on (n_posts, 1): fan_in=1, gain=sqrt(2) -> bound=sqrt(6)
    bound = math.sqrt(6.0)
    attn_inverse = jax.random.uniform(keys[0], (N_POSTS, 1), jnp.float32, -bound, bound)

    layer_params = []
    for l in range(NUM_LAYERS):
        lk = jax.random.split(keys[1 + l], 6)
        wq, bq = _linear_init(lk[0], H_HID, H_HID)
        wk, bk = _linear_init(lk[1], H_HID, H_HID)
        wv, bv = _linear_init(lk[2], H_HID, H_HID)
        wo, bo = _linear_init(lk[3], H_HID, H_HID)
        w1, b1 = _linear_init(lk[4], H_HID, E_HID)
        w2, b2 = _linear_init(lk[5], E_HID, H_HID)
        g1 = jnp.ones((1, H_HID), jnp.float32)
        be1 = jnp.zeros((1, H_HID), jnp.float32)
        g2 = jnp.ones((1, H_HID), jnp.float32)
        be2 = jnp.zeros((1, H_HID), jnp.float32)
        layer_params.append((wq, bq, wk, bk, wv, bv, wo, bo,
                             g1, be1, w1, b1, w2, b2, g2, be2))

    wfc, bfc = _linear_init(keys[1 + NUM_LAYERS], H_HID, C_IN)
    return attn_inverse, tuple(layer_params), wfc, bfc


# =====================  main ==================================================
if __name__ == "__main__":
    root = jax.random.PRNGKey(0)
    k_param, k_xc, k_xs = jax.random.split(root, 3)

    params = init_params(k_param)
    w_slab, v_slab = pack_params(params)          # one-time, outside the hot path

    xc = jax.random.normal(k_xc, (BATCH, H_HID), jnp.float32)
    xs = jax.random.normal(k_xs, (BATCH, H_HID), jnp.float32)

    # mask_nonzero = (batch indices, row indices) of the posts that are kept.
    bidx = jnp.array([0, 0, 0, 1, 1], dtype=jnp.int32)
    ridx = jnp.array([0, 1, 2, 0, 3], dtype=jnp.int32)
    mask_nonzero = (bidx, ridx)

    out = content_reconstruction(xc, xs, mask_nonzero, w_slab, v_slab)
    out = jax.block_until_ready(out)

    # verify against pure-JAX reference
    mask = jnp.zeros((BATCH, N_POSTS), jnp.float32).at[bidx, ridx].set(1.0)
    ref = jax.block_until_ready(ref_forward(xc, xs, mask, params))
    np.testing.assert_allclose(np.asarray(out), np.asarray(ref), rtol=2e-4, atol=2e-4)

    print("KERNEL_OK")
</pallas_src>

<mosaic_0001>
module attributes {stable_mosaic.version = 11 : i64} {
  func.func @_fused_kernel(%arg0: memref<2x1x32xf32, #tpu.memory_space<vmem>>, %arg1: memref<2x8x1xf32, #tpu.memory_space<vmem>>, %arg2: memref<2x1x8xf32, #tpu.memory_space<vmem>>, %arg3: memref<352x128xf32, #tpu.memory_space<vmem>>, %arg4: memref<32x128xf32, #tpu.memory_space<vmem>>, %arg5: memref<16x16xf32, #tpu.memory_space<vmem>>) attributes {dimension_semantics = [], scalar_prefetch = 0 : i64, scratch_operands = 0 : i64, tpu.core_type = #tpu.core_type<tc>} {
    %c0 = arith.constant 0 : index
    %c0_0 = arith.constant 0 : index
    %c0_1 = arith.constant 0 : index
    %0 = vector.load %arg1[%c0, %c0_0, %c0_1] : memref<2x8x1xf32, #tpu.memory_space<vmem>>, vector<2x8x1xf32>
    %c24 = arith.constant 24 : index
    %c0_2 = arith.constant 0 : index
    %1 = vector.load %arg4[%c24, %c0_2] : memref<32x128xf32, #tpu.memory_space<vmem>>, vector<8x1xf32>
    %2 = vector.shape_cast %1 : vector<8x1xf32> to vector<1x8x1xf32>
    %3 = vector.broadcast %2 : vector<1x8x1xf32> to vector<2x8x1xf32>
    %4 = arith.mulf %0, %3 : vector<2x8x1xf32>
    %c0_3 = arith.constant 0 : index
    %c0_4 = arith.constant 0 : index
    %c0_5 = arith.constant 0 : index
    %5 = vector.load %arg0[%c0_3, %c0_4, %c0_5] : memref<2x1x32xf32, #tpu.memory_space<vmem>>, vector<2x1x32xf32>
    %6 = vector.broadcast %4 : vector<2x8x1xf32> to vector<2x8x32xf32>
    %7 = vector.broadcast %5 : vector<2x1x32xf32> to vector<2x8x32xf32>
    %8 = arith.mulf %6, %7 : vector<2x8x32xf32>
    %9 = vector.shape_cast %8 : vector<2x8x32xf32> to vector<16x32xf32>
    %c0_6 = arith.constant 0 : index
    %c0_7 = arith.constant 0 : index
    %c0_8 = arith.constant 0 : index
    %10 = vector.load %arg2[%c0_6, %c0_7, %c0_8] : memref<2x1x8xf32, #tpu.memory_space<vmem>>, vector<2x1x8xf32>
    %cst = arith.constant 1.000000e+00 : f32
    %11 = vector.broadcast %cst : f32 to vector<2x1x8xf32>
    %12 = arith.subf %10, %11 : vector<2x1x8xf32>
    %cst_9 = arith.constant 1.000000e+09 : f32
    %13 = vector.broadcast %cst_9 : f32 to vector<2x1x8xf32>
    %14 = arith.mulf %12, %13 : vector<2x1x8xf32>
    %c17 = arith.constant 17 : index
    %c0_10 = arith.constant 0 : index
    %15 = vector.load %arg4[%c17, %c0_10] : memref<32x128xf32, #tpu.memory_space<vmem>>, vector<1x32xf32>
    %16 = vector.shape_cast %15 : vector<1x32xf32> to vector<1x1x32xf32>
    %c18 = arith.constant 18 : index
    %c0_11 = arith.constant 0 : index
    %17 = vector.load %arg4[%c18, %c0_11] : memref<32x128xf32, #tpu.memory_space<vmem>>, vector<1x32xf32>
    %18 = vector.shape_cast %17 : vector<1x32xf32> to vector<1x1x32xf32>
    %c19 = arith.constant 19 : index
    %c0_12 = arith.constant 0 : index
    %19 = vector.load %arg4[%c19, %c0_12] : memref<32x128xf32, #tpu.memory_space<vmem>>, vector<1x32xf32>
    %20 = vector.shape_cast %19 : vector<1x32xf32> to vector<1x1x32xf32>
    %c20 = arith.constant 20 : index
    %c0_13 = arith.constant 0 : index
    %21 = vector.load %arg4[%c20, %c0_13] : memref<32x128xf32, #tpu.memory_space<vmem>>, vector<1x32xf32>
    %22 = vector.shape_cast %21 : vector<1x32xf32> to vector<1x1x32xf32>
    %c0_14 = arith.constant 0 : index
    %c0_15 = arith.constant 0 : index
    %23 = vector.load %arg3[%c0_14, %c0_15] : memref<352x128xf32, #tpu.memory_space<vmem>>, vector<32x96xf32>
    %c32 = arith.constant 32 : index
    %c0_16 = arith.constant 0 : index
    %24 = vector.load %arg3[%c32, %c0_16] : memref<352x128xf32, #tpu.memory_space<vmem>>, vector<32x32xf32>
    %c64 = arith.constant 64 : index
    %c0_17 = arith.constant 0 : index
    %25 = vector.load %arg3[%c64, %c0_17] : memref<352x128xf32, #tpu.memory_space<vmem>>, vector<32x64xf32>
    %c96 = arith.constant 96 : index
    %c0_18 = arith.constant 0 : index
    %26 = vector.load %arg3[%c96, %c0_18] : memref<352x128xf32, #tpu.memory_space<vmem>>, vector<64x32xf32>
    %c0_19 = arith.constant 0 : index
    %c0_20 = arith.constant 0 : index
    %27 = vector.load %arg4[%c0_19, %c0_20] : memref<32x128xf32, #tpu.memory_space<vmem>>, vector<1x96xf32>
    %c1 = arith.constant 1 : index
    %c0_21 = arith.constant 0 : index
    %28 = vector.load %arg4[%c1, %c0_21] : memref<32x128xf32, #tpu.memory_space<vmem>>, vector<1x32xf32>
    %c2 = arith.constant 2 : index
    %c0_22 = arith.constant 0 : index
    %29 = vector.load %arg4[%c2, %c0_22] : memref<32x128xf32, #tpu.memory_space<vmem>>, vector<1x32xf32>
    %c3 = arith.constant 3 : index
    %c0_23 = arith.constant 0 : index
    %30 = vector.load %arg4[%c3, %c0_23] : memref<32x128xf32, #tpu.memory_space<vmem>>, vector<1x32xf32>
    %c4 = arith.constant 4 : index
    %c0_24 = arith.constant 0 : index
    %31 = vector.load %arg4[%c4, %c0_24] : memref<32x128xf32, #tpu.memory_space<vmem>>, vector<1x64xf32>
    %c5 = arith.constant 5 : index
    %c0_25 = arith.constant 0 : index
    %32 = vector.load %arg4[%c5, %c0_25] : memref<32x128xf32, #tpu.memory_space<vmem>>, vector<1x32xf32>
    %c6 = arith.constant 6 : index
    %c0_26 = arith.constant 0 : index
    %33 = vector.load %arg4[%c6, %c0_26] : memref<32x128xf32, #tpu.memory_space<vmem>>, vector<1x32xf32>
    %c7 = arith.constant 7 : index
    %c0_27 = arith.constant 0 : index
    %34 = vector.load %arg4[%c7, %c0_27] : memref<32x128xf32, #tpu.memory_space<vmem>>, vector<1x32xf32>
    %cst_28 = arith.constant dense<0.000000e+00> : vector<16x96xf32>
    %35 = tpu.matmul %9, %23, %cst_28 {dimension_numbers = #tpu.dot_dimension_numbers<[1], [0], [0], [1], [0, 0, 1, 1], [], []>} : vector<16x32xf32>, vector<32x96xf32>, vector<16x96xf32> -> vector<16x96xf32>
    %36 = vector.broadcast %27 : vector<1x96xf32> to vector<16x96xf32>
    %37 = arith.addf %35, %36 : vector<16x96xf32>
    %38 = vector.extract_strided_slice %37 {offsets = [0, 0], sizes = [16, 32], strides = [1, 1]} : vector<16x96xf32> to vector<16x32xf32>
    %39 = vector.shape_cast %38 : vector<16x32xf32> to vector<2x8x32xf32>
    %40 = vector.extract_strided_slice %37 {offsets = [0, 32], sizes = [16, 32], strides = [1, 1]} : vector<16x96xf32> to vector<16x32xf32>
    %41 = vector.shape_cast %40 : vector<16x32xf32> to vector<2x8x32xf32>
    %42 = vector.extract_strided_slice %37 {offsets = [0, 64], sizes = [16, 32], strides = [1, 1]} : vector<16x96xf32> to vector<16x32xf32>
    %43 = vector.shape_cast %42 : vector<16x32xf32> to vector<2x8x32xf32>
    %44 = vector.broadcast %16 : vector<1x1x32xf32> to vector<2x8x32xf32>
    %45 = arith.mulf %41, %44 : vector<2x8x32xf32>
    "tpu.trace_start"() <{level = 10 : i32, message = "bqc,bkc->bqk"}> : () -> ()
    %cst_29 = arith.constant dense<0.000000e+00> : vector<2x8x8xf32>
    %46 = tpu.matmul %39, %45, %cst_29 {dimension_numbers = #tpu.dot_dimension_numbers<[2], [2], [1], [1], [0, 0, 0, 1, 1, 1], [0], [0]>} : vector<2x8x32xf32>, vector<2x8x32xf32>, vector<2x8x8xf32> -> vector<2x8x8xf32>
    "tpu.trace_stop"() : () -> ()
    %47 = vector.broadcast %14 : vector<2x1x8xf32> to vector<2x8x8xf32>
    %48 = arith.addf %46, %47 : vector<2x8x8xf32>
    %cst_30 = arith.constant dense<0xFF800000> : vector<2x8xf32>
    %49 = vector.multi_reduction <maximumf>, %48, %cst_30 [2] : vector<2x8x8xf32> to vector<2x8xf32>
    %50 = vector.shape_cast %49 : vector<2x8xf32> to vector<2x8x1xf32>
    %51 = vector.broadcast %50 : vector<2x8x1xf32> to vector<2x8x8xf32>
    %52 = arith.subf %48, %51 : vector<2x8x8xf32>
    %53 = math.exp %52 : vector<2x8x8xf32>
    %cst_31 = arith.constant dense<0.000000e+00> : vector<2x8xf32>
    %54 = vector.multi_reduction <add>, %53, %cst_31 [2] : vector<2x8x8xf32> to vector<2x8xf32>
    %55 = vector.shape_cast %54 : vector<2x8xf32> to vector<2x8x1xf32>
    %56 = tpu.reciprocal %55 : vector<2x8x1xf32> -> vector<2x8x1xf32>
    %57 = vector.broadcast %56 : vector<2x8x1xf32> to vector<2x8x8xf32>
    %58 = arith.mulf %53, %57 : vector<2x8x8xf32>
    %59 = vector.broadcast %16 : vector<1x1x32xf32> to vector<2x8x32xf32>
    %60 = arith.mulf %43, %59 : vector<2x8x32xf32>
    "tpu.trace_start"() <{level = 10 : i32, message = "bqk,bkc->bqc"}> : () -> ()
    %cst_32 = arith.constant dense<0.000000e+00> : vector<2x8x32xf32>
    %61 = tpu.matmul %58, %60, %cst_32 {dimension_numbers = #tpu.dot_dimension_numbers<[2], [1], [1], [2], [0, 0, 0, 1, 1, 2], [0], [0]>} : vector<2x8x8xf32>, vector<2x8x32xf32>, vector<2x8x32xf32> -> vector<2x8x32xf32>
    "tpu.trace_stop"() : () -> ()
    %62 = vector.broadcast %18 : vector<1x1x32xf32> to vector<2x8x32xf32>
    %63 = arith.mulf %41, %62 : vector<2x8x32xf32>
    "tpu.trace_start"() <{level = 10 : i32, message = "bqc,bkc->bqk"}> : () -> ()
    %cst_33 = arith.constant dense<0.000000e+00> : vector<2x8x8xf32>
    %64 = tpu.matmul %39, %63, %cst_33 {dimension_numbers = #tpu.dot_dimension_numbers<[2], [2], [1], [1], [0, 0, 0, 1, 1, 1], [0], [0]>} : vector<2x8x32xf32>, vector<2x8x32xf32>, vector<2x8x8xf32> -> vector<2x8x8xf32>
    "tpu.trace_stop"() : () -> ()
    %65 = vector.broadcast %14 : vector<2x1x8xf32> to vector<2x8x8xf32>
    %66 = arith.addf %64, %65 : vector<2x8x8xf32>
    %cst_34 = arith.constant dense<0xFF800000> : vector<2x8xf32>
    %67 = vector.multi_reduction <maximumf>, %66, %cst_34 [2] : vector<2x8x8xf32> to vector<2x8xf32>
    %68 = vector.shape_cast %67 : vector<2x8xf32> to vector<2x8x1xf32>
    %69 = vector.broadcast %68 : vector<2x8x1xf32> to vector<2x8x8xf32>
    %70 = arith.subf %66, %69 : vector<2x8x8xf32>
    %71 = math.exp %70 : vector<2x8x8xf32>
    %cst_35 = arith.constant dense<0.000000e+00> : vector<2x8xf32>
    %72 = vector.multi_reduction <add>, %71, %cst_35 [2] : vector<2x8x8xf32> to vector<2x8xf32>
    %73 = vector.shape_cast %72 : vector<2x8xf32> to vector<2x8x1xf32>
    %74 = tpu.reciprocal %73 : vector<2x8x1xf32> -> vector<2x8x1xf32>
    %75 = vector.broadcast %74 : vector<2x8x1xf32> to vector<2x8x8xf32>
    %76 = arith.mulf %71, %75 : vector<2x8x8xf32>
    %77 = vector.broadcast %18 : vector<1x1x32xf32> to vector<2x8x32xf32>
    %78 = arith.mulf %43, %77 : vector<2x8x32xf32>
    "tpu.trace_start"() <{level = 10 : i32, message = "bqk,bkc->bqc"}> : () -> ()
    %cst_36 = arith.constant dense<0.000000e+00> : vector<2x8x32xf32>
    %79 = tpu.matmul %76, %78, %cst_36 {dimension_numbers = #tpu.dot_dimension_numbers<[2], [1], [1], [2], [0, 0, 0, 1, 1, 2], [0], [0]>} : vector<2x8x8xf32>, vector<2x8x32xf32>, vector<2x8x32xf32> -> vector<2x8x32xf32>
    "tpu.trace_stop"() : () -> ()
    %80 = vector.broadcast %20 : vector<1x1x32xf32> to vector<2x8x32xf32>
    %81 = arith.mulf %41, %80 : vector<2x8x32xf32>
    "tpu.trace_start"() <{level = 10 : i32, message = "bqc,bkc->bqk"}> : () -> ()
    %cst_37 = arith.constant dense<0.000000e+00> : vector<2x8x8xf32>
    %82 = tpu.matmul %39, %81, %cst_37 {dimension_numbers = #tpu.dot_dimension_numbers<[2], [2], [1], [1], [0, 0, 0, 1, 1, 1], [0], [0]>} : vector<2x8x32xf32>, vector<2x8x32xf32>, vector<2x8x8xf32> -> vector<2x8x8xf32>
    "tpu.trace_stop"() : () -> ()
    %83 = vector.broadcast %14 : vector<2x1x8xf32> to vector<2x8x8xf32>
    %84 = arith.addf %82, %83 : vector<2x8x8xf32>
    %cst_38 = arith.constant dense<0xFF800000> : vector<2x8xf32>
    %85 = vector.multi_reduction <maximumf>, %84, %cst_38 [2] : vector<2x8x8xf32> to vector<2x8xf32>
    %86 = vector.shape_cast %85 : vector<2x8xf32> to vector<2x8x1xf32>
    %87 = vector.broadcast %86 : vector<2x8x1xf32> to vector<2x8x8xf32>
    %88 = arith.subf %84, %87 : vector<2x8x8xf32>
    %89 = math.exp %88 : vector<2x8x8xf32>
    %cst_39 = arith.constant dense<0.000000e+00> : vector<2x8xf32>
    %90 = vector.multi_reduction <add>, %89, %cst_39 [2] : vector<2x8x8xf32> to vector<2x8xf32>
    %91 = vector.shape_cast %90 : vector<2x8xf32> to vector<2x8x1xf32>
    %92 = tpu.reciprocal %91 : vector<2x8x1xf32> -> vector<2x8x1xf32>
    %93 = vector.broadcast %92 : vector<2x8x1xf32> to vector<2x8x8xf32>
    %94 = arith.mulf %89, %93 : vector<2x8x8xf32>
    %95 = vector.broadcast %20 : vector<1x1x32xf32> to vector<2x8x32xf32>
    %96 = arith.mulf %43, %95 : vector<2x8x32xf32>
    "tpu.trace_start"() <{level = 10 : i32, message = "bqk,bkc->bqc"}> : () -> ()
    %cst_40 = arith.constant dense<0.000000e+00> : vector<2x8x32xf32>
    %97 = tpu.matmul %94, %96, %cst_40 {dimension_numbers = #tpu.dot_dimension_numbers<[2], [1], [1], [2], [0, 0, 0, 1, 1, 2], [0], [0]>} : vector<2x8x8xf32>, vector<2x8x32xf32>, vector<2x8x32xf32> -> vector<2x8x32xf32>
    "tpu.trace_stop"() : () -> ()
    %98 = vector.broadcast %22 : vector<1x1x32xf32> to vector<2x8x32xf32>
    %99 = arith.mulf %41, %98 : vector<2x8x32xf32>
    "tpu.trace_start"() <{level = 10 : i32, message = "bqc,bkc->bqk"}> : () -> ()
    %cst_41 = arith.constant dense<0.000000e+00> : vector<2x8x8xf32>
    %100 = tpu.matmul %39, %99, %cst_41 {dimension_numbers = #tpu.dot_dimension_numbers<[2], [2], [1], [1], [0, 0, 0, 1, 1, 1], [0], [0]>} : vector<2x8x32xf32>, vector<2x8x32xf32>, vector<2x8x8xf32> -> vector<2x8x8xf32>
    "tpu.trace_stop"() : () -> ()
    %101 = vector.broadcast %14 : vector<2x1x8xf32> to vector<2x8x8xf32>
    %102 = arith.addf %100, %101 : vector<2x8x8xf32>
    %cst_42 = arith.constant dense<0xFF800000> : vector<2x8xf32>
    %103 = vector.multi_reduction <maximumf>, %102, %cst_42 [2] : vector<2x8x8xf32> to vector<2x8xf32>
    %104 = vector.shape_cast %103 : vector<2x8xf32> to vector<2x8x1xf32>
    %105 = vector.broadcast %104 : vector<2x8x1xf32> to vector<2x8x8xf32>
    %106 = arith.subf %102, %105 : vector<2x8x8xf32>
    %107 = math.exp %106 : vector<2x8x8xf32>
    %cst_43 = arith.constant dense<0.000000e+00> : vector<2x8xf32>
    %108 = vector.multi_reduction <add>, %107, %cst_43 [2] : vector<2x8x8xf32> to vector<2x8xf32>
    %109 = vector.shape_cast %108 : vector<2x8xf32> to vector<2x8x1xf32>
    %110 = tpu.reciprocal %109 : vector<2x8x1xf32> -> vector<2x8x1xf32>
    %111 = vector.broadcast %110 : vector<2x8x1xf32> to vector<2x8x8xf32>
    %112 = arith.mulf %107, %111 : vector<2x8x8xf32>
    %113 = vector.broadcast %22 : vector<1x1x32xf32> to vector<2x8x32xf32>
    %114 = arith.mulf %43, %113 : vector<2x8x32xf32>
    "tpu.trace_start"() <{level = 10 : i32, message = "bqk,bkc->bqc"}> : () -> ()
    %cst_44 = arith.constant dense<0.000000e+00> : vector<2x8x32xf32>
    %115 = tpu.matmul %112, %114, %cst_44 {dimension_numbers = #tpu.dot_dimension_numbers<[2], [1], [1], [2], [0, 0, 0, 1, 1, 2], [0], [0]>} : vector<2x8x8xf32>, vector<2x8x32xf32>, vector<2x8x32xf32> -> vector<2x8x32xf32>
    "tpu.trace_stop"() : () -> ()
    %116 = arith.addf %61, %79 : vector<2x8x32xf32>
    %117 = arith.addf %97, %115 : vector<2x8x32xf32>
    %118 = arith.addf %116, %117 : vector<2x8x32xf32>
    %119 = vector.shape_cast %118 : vector<2x8x32xf32> to vector<16x32xf32>
    %cst_45 = arith.constant dense<0.000000e+00> : vector<16x32xf32>
    %120 = tpu.matmul %119, %24, %cst_45 {dimension_numbers = #tpu.dot_dimension_numbers<[1], [0], [0], [1], [0, 0, 1, 1], [], []>} : vector<16x32xf32>, vector<32x32xf32>, vector<16x32xf32> -> vector<16x32xf32>
    %121 = vector.broadcast %28 : vector<1x32xf32> to vector<16x32xf32>
    %122 = arith.addf %120, %121 : vector<16x32xf32>
    %123 = arith.addf %9, %122 : vector<16x32xf32>
    %cst_46 = arith.constant dense<0.000000e+00> : vector<16xf32>
    %124 = vector.multi_reduction <add>, %123, %cst_46 [1] : vector<16x32xf32> to vector<16xf32>
    %125 = vector.shape_cast %124 : vector<16xf32> to vector<16x1xf32>
    %cst_47 = arith.constant 3.200000e+01 : f32
    %126 = vector.broadcast %cst_47 : f32 to vector<16x1xf32>
    %127 = arith.divf %125, %126 : vector<16x1xf32>
    %128 = vector.broadcast %127 : vector<16x1xf32> to vector<16x32xf32>
    %129 = arith.subf %123, %128 : vector<16x32xf32>
    %130 = arith.mulf %129, %129 : vector<16x32xf32>
    %cst_48 = arith.constant dense<0.000000e+00> : vector<16xf32>
    %131 = vector.multi_reduction <add>, %130, %cst_48 [1] : vector<16x32xf32> to vector<16xf32>
    %132 = vector.shape_cast %131 : vector<16xf32> to vector<16x1xf32>
    %cst_49 = arith.constant 3.200000e+01 : f32
    %133 = vector.broadcast %cst_49 : f32 to vector<16x1xf32>
    %134 = arith.divf %132, %133 : vector<16x1xf32>
    %cst_50 = arith.constant 9.99999974E-6 : f32
    %135 = vector.broadcast %cst_50 : f32 to vector<16x1xf32>
    %136 = arith.addf %134, %135 : vector<16x1xf32>
    %137 = math.rsqrt %136 : vector<16x1xf32>
    %138 = vector.broadcast %137 : vector<16x1xf32> to vector<16x32xf32>
    %139 = arith.mulf %129, %138 : vector<16x32xf32>
    %140 = vector.broadcast %29 : vector<1x32xf32> to vector<16x32xf32>
    %141 = arith.mulf %139, %140 : vector<16x32xf32>
    %142 = vector.broadcast %30 : vector<1x32xf32> to vector<16x32xf32>
    %143 = arith.addf %141, %142 : vector<16x32xf32>
    %cst_51 = arith.constant dense<0.000000e+00> : vector<16x64xf32>
    %144 = tpu.matmul %143, %25, %cst_51 {dimension_numbers = #tpu.dot_dimension_numbers<[1], [0], [0], [1], [0, 0, 1, 1], [], []>} : vector<16x32xf32>, vector<32x64xf32>, vector<16x64xf32> -> vector<16x64xf32>
    %145 = vector.broadcast %31 : vector<1x64xf32> to vector<16x64xf32>
    %146 = arith.addf %144, %145 : vector<16x64xf32>
    %cst_52 = arith.constant 0.000000e+00 : f32
    %147 = vector.broadcast %cst_52 : f32 to vector<16x64xf32>
    %148 = arith.maximumf %146, %147 : vector<16x64xf32>
    %cst_53 = arith.constant dense<0.000000e+00> : vector<16x32xf32>
    %149 = tpu.matmul %148, %26, %cst_53 {dimension_numbers = #tpu.dot_dimension_numbers<[1], [0], [0], [1], [0, 0, 1, 1], [], []>} : vector<16x64xf32>, vector<64x32xf32>, vector<16x32xf32> -> vector<16x32xf32>
    %150 = vector.broadcast %32 : vector<1x32xf32> to vector<16x32xf32>
    %151 = arith.addf %149, %150 : vector<16x32xf32>
    %152 = arith.addf %143, %151 : vector<16x32xf32>
    %cst_54 = arith.constant dense<0.000000e+00> : vector<16xf32>
    %153 = vector.multi_reduction <add>, %152, %cst_54 [1] : vector<16x32xf32> to vector<16xf32>
    %154 = vector.shape_cast %153 : vector<16xf32> to vector<16x1xf32>
    %cst_55 = arith.constant 3.200000e+01 : f32
    %155 = vector.broadcast %cst_55 : f32 to vector<16x1xf32>
    %156 = arith.divf %154, %155 : vector<16x1xf32>
    %157 = vector.broadcast %156 : vector<16x1xf32> to vector<16x32xf32>
    %158 = arith.subf %152, %157 : vector<16x32xf32>
    %159 = arith.mulf %158, %158 : vector<16x32xf32>
    %cst_56 = arith.constant dense<0.000000e+00> : vector<16xf32>
    %160 = vector.multi_reduction <add>, %159, %cst_56 [1] : vector<16x32xf32> to vector<16xf32>
    %161 = vector.shape_cast %160 : vector<16xf32> to vector<16x1xf32>
    %cst_57 = arith.constant 3.200000e+01 : f32
    %162 = vector.broadcast %cst_57 : f32 to vector<16x1xf32>
    %163 = arith.divf %161, %162 : vector<16x1xf32>
    %cst_58 = arith.constant 9.99999974E-6 : f32
    %164 = vector.broadcast %cst_58 : f32 to vector<16x1xf32>
    %165 = arith.addf %163, %164 : vector<16x1xf32>
    %166 = math.rsqrt %165 : vector<16x1xf32>
    %167 = vector.broadcast %166 : vector<16x1xf32> to vector<16x32xf32>
    %168 = arith.mulf %158, %167 : vector<16x32xf32>
    %169 = vector.broadcast %33 : vector<1x32xf32> to vector<16x32xf32>
    %170 = arith.mulf %168, %169 : vector<16x32xf32>
    %171 = vector.broadcast %34 : vector<1x32xf32> to vector<16x32xf32>
    %172 = arith.addf %170, %171 : vector<16x32xf32>
    %c160 = arith.constant 160 : index
    %c0_59 = arith.constant 0 : index
    %173 = vector.load %arg3[%c160, %c0_59] : memref<352x128xf32, #tpu.memory_space<vmem>>, vector<32x96xf32>
    %c192 = arith.constant 192 : index
    %c0_60 = arith.constant 0 : index
    %174 = vector.load %arg3[%c192, %c0_60] : memref<352x128xf32, #tpu.memory_space<vmem>>, vector<32x32xf32>
    %c224 = arith.constant 224 : index
    %c0_61 = arith.constant 0 : index
    %175 = vector.load %arg3[%c224, %c0_61] : memref<352x128xf32, #tpu.memory_space<vmem>>, vector<32x64xf32>
    %c256 = arith.constant 256 : index
    %c0_62 = arith.constant 0 : index
    %176 = vector.load %arg3[%c256, %c0_62] : memref<352x128xf32, #tpu.memory_space<vmem>>, vector<64x32xf32>
    %c8 = arith.constant 8 : index
    %c0_63 = arith.constant 0 : index
    %177 = vector.load %arg4[%c8, %c0_63] : memref<32x128xf32, #tpu.memory_space<vmem>>, vector<1x96xf32>
    %c9 = arith.constant 9 : index
    %c0_64 = arith.constant 0 : index
    %178 = vector.load %arg4[%c9, %c0_64] : memref<32x128xf32, #tpu.memory_space<vmem>>, vector<1x32xf32>
    %c10 = arith.constant 10 : index
    %c0_65 = arith.constant 0 : index
    %179 = vector.load %arg4[%c10, %c0_65] : memref<32x128xf32, #tpu.memory_space<vmem>>, vector<1x32xf32>
    %c11 = arith.constant 11 : index
    %c0_66 = arith.constant 0 : index
    %180 = vector.load %arg4[%c11, %c0_66] : memref<32x128xf32, #tpu.memory_space<vmem>>, vector<1x32xf32>
    %c12 = arith.constant 12 : index
    %c0_67 = arith.constant 0 : index
    %181 = vector.load %arg4[%c12, %c0_67] : memref<32x128xf32, #tpu.memory_space<vmem>>, vector<1x64xf32>
    %c13 = arith.constant 13 : index
    %c0_68 = arith.constant 0 : index
    %182 = vector.load %arg4[%c13, %c0_68] : memref<32x128xf32, #tpu.memory_space<vmem>>, vector<1x32xf32>
    %c14 = arith.constant 14 : index
    %c0_69 = arith.constant 0 : index
    %183 = vector.load %arg4[%c14, %c0_69] : memref<32x128xf32, #tpu.memory_space<vmem>>, vector<1x32xf32>
    %c15 = arith.constant 15 : index
    %c0_70 = arith.constant 0 : index
    %184 = vector.load %arg4[%c15, %c0_70] : memref<32x128xf32, #tpu.memory_space<vmem>>, vector<1x32xf32>
    %cst_71 = arith.constant dense<0.000000e+00> : vector<16x96xf32>
    %185 = tpu.matmul %172, %173, %cst_71 {dimension_numbers = #tpu.dot_dimension_numbers<[1], [0], [0], [1], [0, 0, 1, 1], [], []>} : vector<16x32xf32>, vector<32x96xf32>, vector<16x96xf32> -> vector<16x96xf32>
    %186 = vector.broadcast %177 : vector<1x96xf32> to vector<16x96xf32>
    %187 = arith.addf %185, %186 : vector<16x96xf32>
    %188 = vector.extract_strided_slice %187 {offsets = [0, 0], sizes = [16, 32], strides = [1, 1]} : vector<16x96xf32> to vector<16x32xf32>
    %189 = vector.shape_cast %188 : vector<16x32xf32> to vector<2x8x32xf32>
    %190 = vector.extract_strided_slice %187 {offsets = [0, 32], sizes = [16, 32], strides = [1, 1]} : vector<16x96xf32> to vector<16x32xf32>
    %191 = vector.shape_cast %190 : vector<16x32xf32> to vector<2x8x32xf32>
    %192 = vector.extract_strided_slice %187 {offsets = [0, 64], sizes = [16, 32], strides = [1, 1]} : vector<16x96xf32> to vector<16x32xf32>
    %193 = vector.shape_cast %192 : vector<16x32xf32> to vector<2x8x32xf32>
    %194 = vector.broadcast %16 : vector<1x1x32xf32> to vector<2x8x32xf32>
    %195 = arith.mulf %191, %194 : vector<2x8x32xf32>
    "tpu.trace_start"() <{level = 10 : i32, message = "bqc,bkc->bqk"}> : () -> ()
    %cst_72 = arith.constant dense<0.000000e+00> : vector<2x8x8xf32>
    %196 = tpu.matmul %189, %195, %cst_72 {dimension_numbers = #tpu.dot_dimension_numbers<[2], [2], [1], [1], [0, 0, 0, 1, 1, 1], [0], [0]>} : vector<2x8x32xf32>, vector<2x8x32xf32>, vector<2x8x8xf32> -> vector<2x8x8xf32>
    "tpu.trace_stop"() : () -> ()
    %197 = vector.broadcast %14 : vector<2x1x8xf32> to vector<2x8x8xf32>
    %198 = arith.addf %196, %197 : vector<2x8x8xf32>
    %cst_73 = arith.constant dense<0xFF800000> : vector<2x8xf32>
    %199 = vector.multi_reduction <maximumf>, %198, %cst_73 [2] : vector<2x8x8xf32> to vector<2x8xf32>
    %200 = vector.shape_cast %199 : vector<2x8xf32> to vector<2x8x1xf32>
    %201 = vector.broadcast %200 : vector<2x8x1xf32> to vector<2x8x8xf32>
    %202 = arith.subf %198, %201 : vector<2x8x8xf32>
    %203 = math.exp %202 : vector<2x8x8xf32>
    %cst_74 = arith.constant dense<0.000000e+00> : vector<2x8xf32>
    %204 = vector.multi_reduction <add>, %203, %cst_74 [2] : vector<2x8x8xf32> to vector<2x8xf32>
    %205 = vector.shape_cast %204 : vector<2x8xf32> to vector<2x8x1xf32>
    %206 = tpu.reciprocal %205 : vector<2x8x1xf32> -> vector<2x8x1xf32>
    %207 = vector.broadcast %206 : vector<2x8x1xf32> to vector<2x8x8xf32>
    %208 = arith.mulf %203, %207 : vector<2x8x8xf32>
    %209 = vector.broadcast %16 : vector<1x1x32xf32> to vector<2x8x32xf32>
    %210 = arith.mulf %193, %209 : vector<2x8x32xf32>
    "tpu.trace_start"() <{level = 10 : i32, message = "bqk,bkc->bqc"}> : () -> ()
    %cst_75 = arith.constant dense<0.000000e+00> : vector<2x8x32xf32>
    %211 = tpu.matmul %208, %210, %cst_75 {dimension_numbers = #tpu.dot_dimension_numbers<[2], [1], [1], [2], [0, 0, 0, 1, 1, 2], [0], [0]>} : vector<2x8x8xf32>, vector<2x8x32xf32>, vector<2x8x32xf32> -> vector<2x8x32xf32>
    "tpu.trace_stop"() : () -> ()
    %212 = vector.broadcast %18 : vector<1x1x32xf32> to vector<2x8x32xf32>
    %213 = arith.mulf %191, %212 : vector<2x8x32xf32>
    "tpu.trace_start"() <{level = 10 : i32, message = "bqc,bkc->bqk"}> : () -> ()
    %cst_76 = arith.constant dense<0.000000e+00> : vector<2x8x8xf32>
    %214 = tpu.matmul %189, %213, %cst_76 {dimension_numbers = #tpu.dot_dimension_numbers<[2], [2], [1], [1], [0, 0, 0, 1, 1, 1], [0], [0]>} : vector<2x8x32xf32>, vector<2x8x32xf32>, vector<2x8x8xf32> -> vector<2x8x8xf32>
    "tpu.trace_stop"() : () -> ()
    %215 = vector.broadcast %14 : vector<2x1x8xf32> to vector<2x8x8xf32>
    %216 = arith.addf %214, %215 : vector<2x8x8xf32>
    %cst_77 = arith.constant dense<0xFF800000> : vector<2x8xf32>
    %217 = vector.multi_reduction <maximumf>, %216, %cst_77 [2] : vector<2x8x8xf32> to vector<2x8xf32>
    %218 = vector.shape_cast %217 : vector<2x8xf32> to vector<2x8x1xf32>
    %219 = vector.broadcast %218 : vector<2x8x1xf32> to vector<2x8x8xf32>
    %220 = arith.subf %216, %219 : vector<2x8x8xf32>
    %221 = math.exp %220 : vector<2x8x8xf32>
    %cst_78 = arith.constant dense<0.000000e+00> : vector<2x8xf32>
    %222 = vector.multi_reduction <add>, %221, %cst_78 [2] : vector<2x8x8xf32> to vector<2x8xf32>
    %223 = vector.shape_cast %222 : vector<2x8xf32> to vector<2x8x1xf32>
    %224 = tpu.reciprocal %223 : vector<2x8x1xf32> -> vector<2x8x1xf32>
    %225 = vector.broadcast %224 : vector<2x8x1xf32> to vector<2x8x8xf32>
    %226 = arith.mulf %221, %225 : vector<2x8x8xf32>
    %227 = vector.broadcast %18 : vector<1x1x32xf32> to vector<2x8x32xf32>
    %228 = arith.mulf %193, %227 : vector<2x8x32xf32>
    "tpu.trace_start"() <{level = 10 : i32, message = "bqk,bkc->bqc"}> : () -> ()
    %cst_79 = arith.constant dense<0.000000e+00> : vector<2x8x32xf32>
    %229 = tpu.matmul %226, %228, %cst_79 {dimension_numbers = #tpu.dot_dimension_numbers<[2], [1], [1], [2], [0, 0, 0, 1, 1, 2], [0], [0]>} : vector<2x8x8xf32>, vector<2x8x32xf32>, vector<2x8x32xf32> -> vector<2x8x32xf32>
    "tpu.trace_stop"() : () -> ()
    %230 = vector.broadcast %20 : vector<1x1x32xf32> to vector<2x8x32xf32>
    %231 = arith.mulf %191, %230 : vector<2x8x32xf32>
    "tpu.trace_start"() <{level = 10 : i32, message = "bqc,bkc->bqk"}> : () -> ()
    %cst_80 = arith.constant dense<0.000000e+00> : vector<2x8x8xf32>
    %232 = tpu.matmul %189, %231, %cst_80 {dimension_numbers = #tpu.dot_dimension_numbers<[2], [2], [1], [1], [0, 0, 0, 1, 1, 1], [0], [0]>} : vector<2x8x32xf32>, vector<2x8x32xf32>, vector<2x8x8xf32> -> vector<2x8x8xf32>
    "tpu.trace_stop"() : () -> ()
    %233 = vector.broadcast %14 : vector<2x1x8xf32> to vector<2x8x8xf32>
    %234 = arith.addf %232, %233 : vector<2x8x8xf32>
    %cst_81 = arith.constant dense<0xFF800000> : vector<2x8xf32>
    %235 = vector.multi_reduction <maximumf>, %234, %cst_81 [2] : vector<2x8x8xf32> to vector<2x8xf32>
    %236 = vector.shape_cast %235 : vector<2x8xf32> to vector<2x8x1xf32>
    %237 = vector.broadcast %236 : vector<2x8x1xf32> to vector<2x8x8xf32>
    %238 = arith.subf %234, %237 : vector<2x8x8xf32>
    %239 = math.exp %238 : vector<2x8x8xf32>
    %cst_82 = arith.constant dense<0.000000e+00> : vector<2x8xf32>
    %240 = vector.multi_reduction <add>, %239, %cst_82 [2] : vector<2x8x8xf32> to vector<2x8xf32>
    %241 = vector.shape_cast %240 : vector<2x8xf32> to vector<2x8x1xf32>
    %242 = tpu.reciprocal %241 : vector<2x8x1xf32> -> vector<2x8x1xf32>
    %243 = vector.broadcast %242 : vector<2x8x1xf32> to vector<2x8x8xf32>
    %244 = arith.mulf %239, %243 : vector<2x8x8xf32>
    %245 = vector.broadcast %20 : vector<1x1x32xf32> to vector<2x8x32xf32>
    %246 = arith.mulf %193, %245 : vector<2x8x32xf32>
    "tpu.trace_start"() <{level = 10 : i32, message = "bqk,bkc->bqc"}> : () -> ()
    %cst_83 = arith.constant dense<0.000000e+00> : vector<2x8x32xf32>
    %247 = tpu.matmul %244, %246, %cst_83 {dimension_numbers = #tpu.dot_dimension_numbers<[2], [1], [1], [2], [0, 0, 0, 1, 1, 2], [0], [0]>} : vector<2x8x8xf32>, vector<2x8x32xf32>, vector<2x8x32xf32> -> vector<2x8x32xf32>
    "tpu.trace_stop"() : () -> ()
    %248 = vector.broadcast %22 : vector<1x1x32xf32> to vector<2x8x32xf32>
    %249 = arith.mulf %191, %248 : vector<2x8x32xf32>
    "tpu.trace_start"() <{level = 10 : i32, message = "bqc,bkc->bqk"}> : () -> ()
    %cst_84 = arith.constant dense<0.000000e+00> : vector<2x8x8xf32>
    %250 = tpu.matmul %189, %249, %cst_84 {dimension_numbers = #tpu.dot_dimension_numbers<[2], [2], [1], [1], [0, 0, 0, 1, 1, 1], [0], [0]>} : vector<2x8x32xf32>, vector<2x8x32xf32>, vector<2x8x8xf32> -> vector<2x8x8xf32>
    "tpu.trace_stop"() : () -> ()
    %251 = vector.broadcast %14 : vector<2x1x8xf32> to vector<2x8x8xf32>
    %252 = arith.addf %250, %251 : vector<2x8x8xf32>
    %cst_85 = arith.constant dense<0xFF800000> : vector<2x8xf32>
    %253 = vector.multi_reduction <maximumf>, %252, %cst_85 [2] : vector<2x8x8xf32> to vector<2x8xf32>
    %254 = vector.shape_cast %253 : vector<2x8xf32> to vector<2x8x1xf32>
    %255 = vector.broadcast %254 : vector<2x8x1xf32> to vector<2x8x8xf32>
    %256 = arith.subf %252, %255 : vector<2x8x8xf32>
    %257 = math.exp %256 : vector<2x8x8xf32>
    %cst_86 = arith.constant dense<0.000000e+00> : vector<2x8xf32>
    %258 = vector.multi_reduction <add>, %257, %cst_86 [2] : vector<2x8x8xf32> to vector<2x8xf32>
    %259 = vector.shape_cast %258 : vector<2x8xf32> to vector<2x8x1xf32>
    %260 = tpu.reciprocal %259 : vector<2x8x1xf32> -> vector<2x8x1xf32>
    %261 = vector.broadcast %260 : vector<2x8x1xf32> to vector<2x8x8xf32>
    %262 = arith.mulf %257, %261 : vector<2x8x8xf32>
    %263 = vector.broadcast %22 : vector<1x1x32xf32> to vector<2x8x32xf32>
    %264 = arith.mulf %193, %263 : vector<2x8x32xf32>
    "tpu.trace_start"() <{level = 10 : i32, message = "bqk,bkc->bqc"}> : () -> ()
    %cst_87 = arith.constant dense<0.000000e+00> : vector<2x8x32xf32>
    %265 = tpu.matmul %262, %264, %cst_87 {dimension_numbers = #tpu.dot_dimension_numbers<[2], [1], [1], [2], [0, 0, 0, 1, 1, 2], [0], [0]>} : vector<2x8x8xf32>, vector<2x8x32xf32>, vector<2x8x32xf32> -> vector<2x8x32xf32>
    "tpu.trace_stop"() : () -> ()
    %266 = arith.addf %211, %229 : vector<2x8x32xf32>
    %267 = arith.addf %247, %265 : vector<2x8x32xf32>
    %268 = arith.addf %266, %267 : vector<2x8x32xf32>
    %269 = vector.shape_cast %268 : vector<2x8x32xf32> to vector<16x32xf32>
    %cst_88 = arith.constant dense<0.000000e+00> : vector<16x32xf32>
    %270 = tpu.matmul %269, %174, %cst_88 {dimension_numbers = #tpu.dot_dimension_numbers<[1], [0], [0], [1], [0, 0, 1, 1], [], []>} : vector<16x32xf32>, vector<32x32xf32>, vector<16x32xf32> -> vector<16x32xf32>
    %271 = vector.broadcast %178 : vector<1x32xf32> to vector<16x32xf32>
    %272 = arith.addf %270, %271 : vector<16x32xf32>
    %273 = arith.addf %172, %272 : vector<16x32xf32>
    %cst_89 = arith.constant dense<0.000000e+00> : vector<16xf32>
    %274 = vector.multi_reduction <add>, %273, %cst_89 [1] : vector<16x32xf32> to vector<16xf32>
    %275 = vector.shape_cast %274 : vector<16xf32> to vector<16x1xf32>
    %cst_90 = arith.constant 3.200000e+01 : f32
    %276 = vector.broadcast %cst_90 : f32 to vector<16x1xf32>
    %277 = arith.divf %275, %276 : vector<16x1xf32>
    %278 = vector.broadcast %277 : vector<16x1xf32> to vector<16x32xf32>
    %279 = arith.subf %273, %278 : vector<16x32xf32>
    %280 = arith.mulf %279, %279 : vector<16x32xf32>
    %cst_91 = arith.constant dense<0.000000e+00> : vector<16xf32>
    %281 = vector.multi_reduction <add>, %280, %cst_91 [1] : vector<16x32xf32> to vector<16xf32>
    %282 = vector.shape_cast %281 : vector<16xf32> to vector<16x1xf32>
    %cst_92 = arith.constant 3.200000e+01 : f32
    %283 = vector.broadcast %cst_92 : f32 to vector<16x1xf32>
    %284 = arith.divf %282, %283 : vector<16x1xf32>
    %cst_93 = arith.constant 9.99999974E-6 : f32
    %285 = vector.broadcast %cst_93 : f32 to vector<16x1xf32>
    %286 = arith.addf %284, %285 : vector<16x1xf32>
    %287 = math.rsqrt %286 : vector<16x1xf32>
    %288 = vector.broadcast %287 : vector<16x1xf32> to vector<16x32xf32>
    %289 = arith.mulf %279, %288 : vector<16x32xf32>
    %290 = vector.broadcast %179 : vector<1x32xf32> to vector<16x32xf32>
    %291 = arith.mulf %289, %290 : vector<16x32xf32>
    %292 = vector.broadcast %180 : vector<1x32xf32> to vector<16x32xf32>
    %293 = arith.addf %291, %292 : vector<16x32xf32>
    %cst_94 = arith.constant dense<0.000000e+00> : vector<16x64xf32>
    %294 = tpu.matmul %293, %175, %cst_94 {dimension_numbers = #tpu.dot_dimension_numbers<[1], [0], [0], [1], [0, 0, 1, 1], [], []>} : vector<16x32xf32>, vector<32x64xf32>, vector<16x64xf32> -> vector<16x64xf32>
    %295 = vector.broadcast %181 : vector<1x64xf32> to vector<16x64xf32>
    %296 = arith.addf %294, %295 : vector<16x64xf32>
    %cst_95 = arith.constant 0.000000e+00 : f32
    %297 = vector.broadcast %cst_95 : f32 to vector<16x64xf32>
    %298 = arith.maximumf %296, %297 : vector<16x64xf32>
    %cst_96 = arith.constant dense<0.000000e+00> : vector<16x32xf32>
    %299 = tpu.matmul %298, %176, %cst_96 {dimension_numbers = #tpu.dot_dimension_numbers<[1], [0], [0], [1], [0, 0, 1, 1], [], []>} : vector<16x64xf32>, vector<64x32xf32>, vector<16x32xf32> -> vector<16x32xf32>
    %300 = vector.broadcast %182 : vector<1x32xf32> to vector<16x32xf32>
    %301 = arith.addf %299, %300 : vector<16x32xf32>
    %302 = arith.addf %293, %301 : vector<16x32xf32>
    %cst_97 = arith.constant dense<0.000000e+00> : vector<16xf32>
    %303 = vector.multi_reduction <add>, %302, %cst_97 [1] : vector<16x32xf32> to vector<16xf32>
    %304 = vector.shape_cast %303 : vector<16xf32> to vector<16x1xf32>
    %cst_98 = arith.constant 3.200000e+01 : f32
    %305 = vector.broadcast %cst_98 : f32 to vector<16x1xf32>
    %306 = arith.divf %304, %305 : vector<16x1xf32>
    %307 = vector.broadcast %306 : vector<16x1xf32> to vector<16x32xf32>
    %308 = arith.subf %302, %307 : vector<16x32xf32>
    %309 = arith.mulf %308, %308 : vector<16x32xf32>
    %cst_99 = arith.constant dense<0.000000e+00> : vector<16xf32>
    %310 = vector.multi_reduction <add>, %309, %cst_99 [1] : vector<16x32xf32> to vector<16xf32>
    %311 = vector.shape_cast %310 : vector<16xf32> to vector<16x1xf32>
    %cst_100 = arith.constant 3.200000e+01 : f32
    %312 = vector.broadcast %cst_100 : f32 to vector<16x1xf32>
    %313 = arith.divf %311, %312 : vector<16x1xf32>
    %cst_101 = arith.constant 9.99999974E-6 : f32
    %314 = vector.broadcast %cst_101 : f32 to vector<16x1xf32>
    %315 = arith.addf %313, %314 : vector<16x1xf32>
    %316 = math.rsqrt %315 : vector<16x1xf32>
    %317 = vector.broadcast %316 : vector<16x1xf32> to vector<16x32xf32>
    %318 = arith.mulf %308, %317 : vector<16x32xf32>
    %319 = vector.broadcast %183 : vector<1x32xf32> to vector<16x32xf32>
    %320 = arith.mulf %318, %319 : vector<16x32xf32>
    %321 = vector.broadcast %184 : vector<1x32xf32> to vector<16x32xf32>
    %322 = arith.addf %320, %321 : vector<16x32xf32>
    %c320 = arith.constant 320 : index
    %c0_102 = arith.constant 0 : index
    %323 = vector.load %arg3[%c320, %c0_102] : memref<352x128xf32, #tpu.memory_space<vmem>>, vector<32x16xf32>
    %c16 = arith.constant 16 : index
    %c0_103 = arith.constant 0 : index
    %324 = vector.load %arg4[%c16, %c0_103] : memref<32x128xf32, #tpu.memory_space<vmem>>, vector<1x16xf32>
    %cst_104 = arith.constant dense<0.000000e+00> : vector<16x16xf32>
    %325 = tpu.matmul %322, %323, %cst_104 {dimension_numbers = #tpu.dot_dimension_numbers<[1], [0], [0], [1], [0, 0, 1, 1], [], []>} : vector<16x32xf32>, vector<32x16xf32>, vector<16x16xf32> -> vector<16x16xf32>
    %326 = vector.broadcast %324 : vector<1x16xf32> to vector<16x16xf32>
    %327 = arith.addf %325, %326 : vector<16x16xf32>
    %328 = vector.shape_cast %0 : vector<2x8x1xf32> to vector<16x1xf32>
    %329 = vector.broadcast %328 : vector<16x1xf32> to vector<16x16xf32>
    %330 = arith.mulf %327, %329 : vector<16x16xf32>
    %c0_105 = arith.constant 0 : index
    %c0_106 = arith.constant 0 : index
    %331 = vector.load %arg5[%c0_105, %c0_106] : memref<16x16xf32, #tpu.memory_space<vmem>>, vector<16x16xf32>
    tpu.vector_store %arg5[%c0_105, %c0_106], %330 {strides = array<i32>} : memref<16x16xf32, #tpu.memory_space<vmem>>, vector<16x16xf32>,
    return
  }
}

</mosaic_0001>

<bundles_post_ra>
// kernel: content_reconstruction.1
= control target key start
LH: loop header
LB: loop body
LE: loop exit
PB: predicated region body
PF: predicated region fallthrough
CT: control target
= control target key end

     0   :  { %v4406_v3 = vmov 0   ;;  %s5117_s0 = inlined_call_operand.vmem [shape: f32[2,1,32], index: 0, kind: input, shape index: {}]   ;;  %s5118_s1 = inlined_call_operand.vmem [shape: f32[2,8,1], index: 1, kind: input, shape index: {}]   ;;  %s5119_s2 = inlined_call_operand.vmem [shape: f32[2,1,8], index: 2, kind: input, shape index: {}]   ;;  %s5120_s3 = inlined_call_operand.vmem [shape: f32[352,128], index: 3, kind: input, shape index: {}]   ;;  %s5121_s4 = inlined_call_operand.vmem [shape: f32[32,128], index: 4, kind: input, shape index: {}]   ;;  %s5122_s5 = inlined_call_operand.hbm [shape: f32[16,16], index: 5, kind: output, shape index: {}]  }
   0x1   :  { %v21_v0 = vld [vmem:[%s5118_s1] sm:$0xff]  ;;  %v22_v1 = vld [vmem:[%s5118_s1 + $0x8] sm:$0xff]  ;;  %v23_v2 = vld [vmem:[%s5121_s4 + $0x18] sm:$0xff]  ;;  %4300 = vset.pattern.permute.xlu0 %v4406_v3  ;;  %4301 = vset.pattern.permute.xlu1 %v4406_v3 }
   0x2   :  { %v24_v4 = vmul.f32 %v23_v2, %v21_v0  ;;  %v65_v5 = vld [vmem:[%s5120_s3 + $0x18] sm:$0xff]  ;;  %v64_v6 = vld [vmem:[%s5120_s3 + $0x10] sm:$0xff]  ;;  %v25_v7 = vmul.f32 %v23_v2, %v22_v1  ;;  %v63_v8 = vld [vmem:[%s5120_s3 + $0x8] sm:$0xff] }
   0x3   :  { %4016 = vmatprep.subr.mxu0 %v65_v5 }
   0x4   :  { %30 = vperm.xlu0 %4300, %v24_v4   ;;  %4017 = vmatpush3.msra.mxu0 %v65_v5 }
   0x5   :  { %10 = vsyncpa [#allocation3], 0  ;;  %4018 = vmatprep.subr.mxu0 %v64_v6  ;;  %v62_v9 = vld [vmem:[%s5120_s3] sm:$0xff]  ;;  %v4469_v10 = vld [vmem:[%s5121_s4 + $0x11] ss:$0 sm:$0xff]  ;;  %s4407_s9 = smov 32   ;;  %v188_v34 = vlaneseq }
   0x6   :  { %4019 = vmatpush3.msra.mxu0 %v64_v6  ;;  %181 = vrot.lane.b32.xlu1 %v4469_v10, %s4407_s9  ;;  %v4476_v11 = vld [vmem:[%s5121_s4 + $0x12] ss:$0 sm:$0xff]  ;;  %v3799_v12 = vld [vmem:[%s5117_s0] ss:$0 sm:$0xff]  ;;  %vm94_vm0 = vcmask 261120   ;;  %v4408_v18 = vmov 0.0  }
   0x7   :  { %4020 = vmatprep.subr.mxu0 %v63_v8  ;;  %v3800_v15 = vld [vmem:[%s5117_s0 + $0x1] ss:$0 sm:$0xff]  ;;  %4027 = vmatprep.subr.mxu1 %v4408_v18  ;;  %vm4409_vm1 = vmmov 0   ;;  %v3803_v20 = vld [vmem:[%s5121_s4] ss:$0 sm:$0xff]  ;;  %s4410_s17 = smov 96  }
   0x8   :  { %35 = vperm.xlu0 %4300, %v25_v7   ;;  %4021 = vmatpush3.msra.mxu0 %v63_v8  ;;  %v52_v35 = vld [vmem:[%s5119_s2] sm:$0x1]  ;;  %v189_v37 = vshrl.u32 %v188_v34, 7  ;;  %v53_v39 = vld [vmem:[%s5119_s2 + $0x1] sm:$0x1]  ;;  %vm354_vm2 = vcmask 64512  }
   0x9   :  { %4022 = vmatprep.subr.mxu0 %v62_v9  ;;  %4029 = vmatprep.mubr.msk.f32.mxu1 %vm4409_vm1, %v4408_v18  ;;  %v3801_v36 = vadd.f32 -1.0, %v52_v35  ;;  %v3802_v43 = vadd.f32 -1.0, %v53_v39  ;;  %v4566_v57 = vld [vmem:[%s5121_s4 + $0x13] ss:$0 sm:$0xff]  ;;  %s4411_s23 = smov 64   ;;  %vm1778_vm3 = vcmask 523264  }
   0xa   :  { %4023 = vmatpush3.msra.mxu0 %v62_v9  ;;  %387 = vrot.lane.b32.xlu1 %v4476_v11, %s4407_s9  ;;  %v190_v42 = vsub.s32 0, %v189_v37  ;;  %v4575_v58 = vld [vmem:[%s5121_s4 + $0x14] ss:$0 sm:$0xff]  ;;  %vm3780_vm4 = vcmask 130048  }
   0xb   :  { %4047 = vmatprep.subr.mxu0 %v4408_v18  ;;  %v56_v41 = vmul.f32 1e+09, %v3801_v36  ;;  %v57_v47 = vmul.f32 1e+09, %v3802_v43 }
   0xd   :  { %v4555_v46 = vrot.slane %v56_v41, %v190_v42  ;;  %v4558_v51 = vrot.slane %v57_v47, %v190_v42 }
  0x78   :  { %v4500_v19 = vpop.permute.xlu1 %181 }
  0x7c   :  { %v4511_v26 = vpop.permute.xlu1 %387 }
  0x7f   :  { %v31_v13 = vpop.permute.xlu0 %30 }
  0x80   :  { %v4483_v14 = vmul.f32 %v3799_v12, %v31_v13 }
  0x82   :  { %4024 = vmatprep.mubr.msk.f32.mxu0 %vm94_vm0, %v4483_v14 }
  0x83   :  { %v36_v16 = vpop.permute.xlu0 %35 }
  0x84   :  { %v4490_v17 = vmul.f32 %v3800_v15, %v36_v16 }
  0x86   :  { %4025 = vmatmul.mubr.msk.f32.vlgmr.msra.gmra.mxu0 %vm94_vm0, %v4490_v17 }
  0x87   :  { %4049 = vmatprep.mubr.msk.f32.mxu0 %vm4409_vm1, %v4408_v18 }
 0x146   :  { %v4026_v21 = vpop.f32.mrf.mxu0 }
 0x147   :  { %v4505_v22 = vadd.f32 %v4026_v21, %v3803_v20 }
 0x148   :  { %v167_v23 = vpop.f32.mrf.mxu0 }
 0x149   :  { %v4507_v24 = vadd.f32 %v3803_v20, %v167_v23  ;;  %v185_v25 = vmul.f32 %v4500_v19, %v4505_v22  ;;  %v391_v28 = vmul.f32 %v4511_v26, %v4505_v22 }
 0x14b   :  { %277 = vrot.lane.b32.xlu1 %v185_v25, %s4410_s17  ;;  %v184_v27 = vmul.f32 %v4500_v19, %v4507_v24  ;;  %v390_v29 = vmul.f32 %v4511_v26, %v4507_v24 }
 0x14d   :  { %199 = vrot.lane.b32.xlu0 %v184_v27, %s4410_s17 }
 0x14f   :  { %468 = vrot.lane.b32.xlu1 %v391_v28, %s4410_s17 }
 0x151   :  { %393 = vrot.lane.b32.xlu0 %v390_v29, %s4410_s17 }
 0x1bd   :  { %v278_v31 = vpop.permute.xlu1 %277 }
 0x1bf   :  { %v200_v30 = vpop.permute.xlu0 %199 }
 0x1c0   :  { %4028 = vmatpush3.xpose.msk.msra.mxu1 %vm94_vm0, %v200_v30 }
 0x1c1   :  { %4032 = vmatprep.subr.mxu1 %v4408_v18  ;;  %v469_v33 = vpop.permute.xlu1 %468 }
 0x1c3   :  { %4030 = vmatmul.mubr.msk.f32.vlgmr.msra.gmra.mxu1 %vm94_vm0, %v4507_v24  ;;  %v394_v32 = vpop.permute.xlu0 %393 }
 0x1c4   :  { %4033 = vmatpush3.xpose.msk.msra.mxu1 %vm94_vm0, %v278_v31  ;;  %4034 = vmatprep.mubr.msk.f32.mxu1 %vm4409_vm1, %v4408_v18 }
 0x1c5   :  { %4037 = vmatprep.subr.mxu1 %v4408_v18 }
 0x1c7   :  { %4035 = vmatmul.mubr.msk.f32.vlgmr.msra.gmra.mxu1 %vm94_vm0, %v4505_v22 }
 0x1c8   :  { %4038 = vmatpush3.xpose.msk.msra.mxu1 %vm94_vm0, %v394_v32  ;;  %4039 = vmatprep.mubr.msk.f32.mxu1 %vm4409_vm1, %v4408_v18 }
 0x1c9   :  { %4042 = vmatprep.subr.mxu1 %v4408_v18 }
 0x1cb   :  { %4040 = vmatmul.mubr.msk.f32.vlgmr.msra.gmra.mxu1 %vm94_vm0, %v4507_v24 }
 0x1cc   :  { %4043 = vmatpush3.xpose.msk.msra.mxu1 %vm94_vm0, %v469_v33  ;;  %4044 = vmatprep.mubr.msk.f32.mxu1 %vm4409_vm1, %v4408_v18 }
 0x1cd   :  { %4052 = vmatprep.subr.mxu1 %v4408_v18 }
 0x1cf   :  { %4045 = vmatmul.mubr.msk.f32.vlgmr.msra.gmra.mxu1 %vm94_vm0, %v4505_v22 }
 0x1d0   :  { %4054 = vmatprep.mubr.msk.f32.mxu1 %vm4409_vm1, %v4408_v18 }
 0x283   :  { %v272_v38 = vpop.f32.mrf.mxu1 }
 0x284   :  { %v4606_v16 = vadd.f32 %v272_v38, %v4555_v46 }
 0x285   :  { %v4031_v40 = vpop.f32.mrf.mxu1 }
 0x286   :  { %v355_v20 = vsel %vm354_vm2, %v4606_v16, -inf }
 0x287   :  { %v4553_v44 = vpop.f32.mrf.mxu1 }
 0x289   :  { %v4036_v45 = vpop.f32.mrf.mxu1 }
 0x28b   :  { %v463_v48 = vpop.f32.mrf.mxu1 }
 0x28c   :  { %v464_v49 = vadd.f32 %v463_v48, %v4555_v46 }
 0x28d   :  { %v4041_v50 = vpop.f32.mrf.mxu1 }
 0x28e   :  { %v542_v52 = vsel %vm354_vm2, %v464_v49, -inf }
 0x28f   :  { %543 = vmax.xlane.f32.xlu0 %v542_v52  ;;  %v538_v53 = vpop.f32.mrf.mxu1 }
 0x290   :  { %v539_v54 = vadd.f32 %v538_v53, %v4558_v51 }
 0x291   :  { %v4046_v55 = vpop.f32.mrf.mxu1 }
 0x292   :  { %v545_v56 = vsel %vm354_vm2, %v539_v54, -inf  ;;  %v351_v55 = vadd.f32 %v4553_v44, %v4558_v51 }
 0x293   :  { %546 = vmax.xlane.f32.xlu1 %v545_v56 }
 0x2a4   :  { %728 = vrot.lane.b32.xlu1 %v4566_v57, %s4407_s9 }
 0x2a5   :  { %564 = vrot.lane.b32.xlu0 %v4476_v11, %s4411_s23 }
 0x2a9   :  { %915 = vrot.lane.b32.xlu0 %v4575_v58, %s4407_s9  ;;  %s4412_s9 = smov [#allocation2]  }
 0x2aa   :  { %s3788_s10 = sshll.u32 %s4412_s9, 4  ;;  %s3789_s10 = int_to_ptr.vmem [resolvable:$true] %s3788_s10 }
 0x2ab   :  { %s4384_s11 = scalar_lea.vmem %s3789_s10, 256  ;;  %p4389_p1 = scmp.lt.s32.totalorder %s3789_s10, %s3789_s10 }
 0x2ac   :  { %p4385_p0 = scmp.ne.s32.totalorder %s3789_s10, %s4384_s11  ;;  %p4390_p2 = scmp.lt.s32.totalorder %s4384_s11, %s4384_s11 }
 0x2ae   :  { %p4391_p3 = por %p4390_p2, %p4389_p1 }
 0x2b0   :  { %p4392_p4 = pnand %p4391_p3, %p4385_p0 }
 0x318   :  { %v544_v59 = vpop.xlane.xlu0 %543 }
 0x319   :  { %v548_v4 = vsub.f32 %v464_v49, %v544_v59 }
 0x31b   :  { %v550_v5 = vmul.f32 1.442695, %v548_v4 }
 0x31c   :  { %v4579_v60 = vpop.permute.xlu0 %564  ;;  %v547_v61 = vpop.xlane.xlu1 %546 }
 0x31d   :  { %v567_v62 = vmul.f32 %v4579_v60, %v4507_v24  ;;  %v568_v63 = vmul.f32 %v4579_v60, %v4505_v22  ;;  %v549_v2 = vsub.f32 %v539_v54, %v547_v61 }
 0x31f   :  { %570 = vrot.lane.b32.xlu0 %v567_v62, %s4411_s23  ;;  %647 = vrot.lane.b32.xlu1 %v568_v63, %s4411_s23  ;;  %v552_v3 = vmul.f32 1.442695, %v549_v2  ;;  %v358_v62 = vsel %vm354_vm2, %v351_v55, -inf }
 0x320   :  { %v4587_v0 = vpop.permute.xlu1 %728  ;;  %v4596_v12 = vpop.permute.xlu0 %915 }
 0x321   :  { %v731_v1 = vmul.f32 %v4587_v0, %v4507_v24  ;;  %4302 = vpow2.f32 %v552_v3  ;;  %v732_v11 = vmul.f32 %v4587_v0, %v4505_v22  ;;  %v919_v13 = vmul.f32 %v4596_v12, %v4505_v22 }
 0x322   :  { %4304 = vpow2.f32 %v550_v5  ;;  %v918_v15 = vmul.f32 %v4596_v12, %v4507_v24 }
 0x323   :  { %734 = vrot.lane.b32.xlu1 %v731_v1, %s4410_s17 }
 0x32e   :  { %v4303_v6 = vpop.eup %4302 }
 0x32f   :  { %v557_v7 = vsel %vm354_vm2, %v4303_v6, 0.0  ;;  %v4305_v8 = vpop.eup %4304 }
 0x330   :  { %v554_v9 = vsel %vm354_vm2, %v4305_v8, 0.0 }
 0x33e   :  { %558 = vadd.xlane.f32.xlu0 %v557_v7 }
 0x347   :  { %555 = vadd.xlane.f32.xlu1 %v554_v9 }
 0x354   :  { %809 = vrot.lane.b32.xlu0 %v732_v11, %s4410_s17 }
 0x358   :  { %996 = vrot.lane.b32.xlu0 %v919_v13, %s4410_s17  ;;  %921 = vrot.lane.b32.xlu1 %v918_v15, %s4410_s17 }
 0x377   :  { %356 = vmax.xlane.f32.xlu0 %v355_v20 }
 0x391   :  { %v571_v21 = vpop.permute.xlu0 %570  ;;  %v648_v23 = vpop.permute.xlu1 %647 }
 0x392   :  { %4048 = vmatpush3.msra.mxu0 %v571_v21  ;;  %4053 = vmatpush3.msra.mxu1 %v648_v23 }
 0x393   :  { %4062 = vmatprep.subr.mxu1 %v4408_v18  ;;  %4057 = vmatprep.subr.mxu0 %v4408_v18 }
 0x395   :  { %v735_v27 = vpop.permute.xlu1 %734 }
 0x3c7   :  { %v559_v25 = vpop.xlane.xlu0 %558 }
 0x3c8   :  { %4306 = vrcp.f32 %v559_v25 }
 0x3cb   :  { %v810_v30 = vpop.permute.xlu0 %809 }
 0x3cf   :  { %v997_v32 = vpop.permute.xlu0 %996 }
 0x3d0   :  { %v556_v28 = vpop.xlane.xlu1 %555 }
 0x3d1   :  { %4308 = vrcp.f32 %v556_v28 }
 0x3d4   :  { %v922_v35 = vpop.permute.xlu1 %921 }
 0x3d5   :  { %v4307_v29 = vpop.eup %4306 }
 0x3d6   :  { %v563_v31 = vmul.f32 %v4307_v29, %v4303_v6 }
 0x3d8   :  { %4055 = vmatmul.mubr.msk.f32.vlgmr.msra.gmra.mxu1 %vm354_vm2, %v563_v31 }
 0x3d9   :  { %4063 = vmatpush3.xpose.msk.msra.mxu1 %vm94_vm0, %v810_v30  ;;  %4064 = vmatprep.mubr.msk.f32.mxu1 %vm4409_vm1, %v4408_v18 }
 0x3da   :  { %4072 = vmatprep.subr.mxu1 %v4408_v18 }
 0x3dc   :  { %4065 = vmatmul.mubr.msk.f32.vlgmr.msra.gmra.mxu1 %vm94_vm0, %v4505_v22 }
 0x3dd   :  { %4073 = vmatpush3.xpose.msk.msra.mxu1 %vm94_vm0, %v997_v32  ;;  %4074 = vmatprep.mubr.msk.f32.mxu1 %vm4409_vm1, %v4408_v18 }
 0x3de   :  { %v4309_v33 = vpop.eup %4308  ;;  %4082 = vmatprep.subr.mxu1 %v4408_v18 }
 0x3df   :  { %v562_v34 = vmul.f32 %v4309_v33, %v4305_v8 }
 0x3e0   :  { %4075 = vmatmul.mubr.msk.f32.vlgmr.msra.gmra.mxu1 %vm94_vm0, %v4505_v22 }
 0x3e1   :  { %4050 = vmatmul.mubr.msk.f32.vlgmr.msra.gmra.mxu0 %vm354_vm2, %v562_v34  ;;  %4084 = vmatprep.mubr.msk.f32.mxu1 %vm4409_vm1, %v4408_v18 }
 0x3e2   :  { %4058 = vmatpush3.xpose.msk.msra.mxu0 %vm94_vm0, %v735_v27  ;;  %4059 = vmatprep.mubr.msk.f32.mxu0 %vm4409_vm1, %v4408_v18 }
 0x3e3   :  { %4067 = vmatprep.subr.mxu0 %v4408_v18 }
 0x3e5   :  { %4060 = vmatmul.mubr.msk.f32.vlgmr.msra.gmra.mxu0 %vm94_vm0, %v4507_v24 }
 0x3e6   :  { %4068 = vmatpush3.xpose.msk.msra.mxu0 %vm94_vm0, %v922_v35  ;;  %4069 = vmatprep.mubr.msk.f32.mxu0 %vm4409_vm1, %v4408_v18 }
 0x3e7   :  { %4077 = vmatprep.subr.mxu0 %v4408_v18 }
 0x3e9   :  { %4070 = vmatmul.mubr.msk.f32.vlgmr.msra.gmra.mxu0 %vm94_vm0, %v4507_v24 }
 0x3ea   :  { %4079 = vmatprep.mubr.msk.f32.mxu0 %vm4409_vm1, %v4408_v18 }
 0x400   :  { %v357_v1 = vpop.xlane.xlu0 %356 }
 0x401   :  { %v361_v44 = vsub.f32 %v4606_v16, %v357_v1 }
 0x403   :  { %v363_v2 = vmul.f32 1.442695, %v361_v44 }
 0x405   :  { %4310 = vpow2.f32 %v363_v2 }
 0x412   :  { %v4664_v3 = vpop.eup %4310 }
 0x413   :  { %v367_v4 = vsel %vm354_vm2, %v4664_v3, 0.0 }
 0x498   :  { %v4642_v36 = vpop.f32.mrf.mxu1 }
 0x49a   :  { %v4056_v37 = vpop.f32.mrf.mxu1 }
 0x49c   :  { %v879_v38 = vpop.f32.mrf.mxu1 }
 0x49d   :  { %v880_v61 = vadd.f32 %v879_v38, %v4558_v51 }
 0x49e   :  { %v4066_v39 = vpop.f32.mrf.mxu1 }
 0x49f   :  { %v886_v63 = vsel %vm354_vm2, %v880_v61, -inf }
 0x4a0   :  { %v1066_v40 = vpop.f32.mrf.mxu1 }
 0x4a1   :  { %v4644_v41 = vpop.f32.mrf.mxu0  ;;  %v1067_v49 = vadd.f32 %v1066_v40, %v4558_v51 }
 0x4a2   :  { %v4076_v42 = vpop.f32.mrf.mxu1 }
 0x4a3   :  { %v4051_v43 = vpop.f32.mrf.mxu0  ;;  %v1073_v59 = vsel %vm354_vm2, %v1067_v49, -inf }
 0x4a5   :  { %v804_v45 = vpop.f32.mrf.mxu0 }
 0x4a6   :  { %v805_v47 = vadd.f32 %v804_v45, %v4555_v46 }
 0x4a7   :  { %v4061_v48 = vpop.f32.mrf.mxu0 }
 0x4a8   :  { %v883_v50 = vsel %vm354_vm2, %v805_v47, -inf }
 0x4a9   :  { %884 = vmax.xlane.f32.xlu0 %v883_v50  ;;  %v991_v52 = vpop.f32.mrf.mxu0 }
 0x4aa   :  { %v992_v53 = vadd.f32 %v991_v52, %v4555_v46 }
 0x4ab   :  { %v4071_v54 = vpop.f32.mrf.mxu0 }
 0x4ac   :  { %v1070_v56 = vsel %vm354_vm2, %v992_v53, -inf }
 0x4ad   :  { %1071 = vmax.xlane.f32.xlu1 %v1070_v56  ;;  %1074 = vmax.xlane.f32.xlu0 %v1073_v59 }
 0x4b1   :  { %359 = vmax.xlane.f32.xlu1 %v358_v62 }
 0x4b5   :  { %887 = vmax.xlane.f32.xlu1 %v886_v63 }
 0x4c3   :  { %1092 = vrot.lane.b32.xlu0 %v4575_v58, %s4411_s23 }
 0x4c6   :  { %377 = vrot.lane.b32.xlu1 %v4469_v10, %s4411_s23 }
 0x4ca   :  { %905 = vrot.lane.b32.xlu1 %v4566_v57, %s4411_s23 }
 0x4e2   :  { %368 = vadd.xlane.f32.xlu0 %v367_v4 }
 0x532   :  { %v885_v5 = vpop.xlane.xlu0 %884 }
 0x533   :  { %v889_v23 = vsub.f32 %v805_v47, %v885_v5 }
 0x535   :  { %v891_v25 = vmul.f32 1.442695, %v889_v23 }
 0x536   :  { %v1072_v6 = vpop.xlane.xlu1 %1071  ;;  %v1075_v58 = vpop.xlane.xlu0 %1074 }
 0x537   :  { %v1077_v27 = vsub.f32 %v1067_v49, %v1075_v58  ;;  %v1076_v31 = vsub.f32 %v992_v53, %v1072_v6 }
 0x539   :  { %v1080_v28 = vmul.f32 1.442695, %v1077_v27  ;;  %v1078_v34 = vmul.f32 1.442695, %v1076_v31 }
 0x53a   :  { %v360_v7 = vpop.xlane.xlu1 %359  ;;  %v4668_v8 = vpop.permute.xlu0 %1092 }
 0x53b   :  { %v362_v10 = vsub.f32 %v351_v55, %v360_v7  ;;  %v1095_v9 = vmul.f32 %v4668_v8, %v4507_v24  ;;  %v1096_v29 = vmul.f32 %v4668_v8, %v4505_v22 }
 0x53d   :  { %v365_v11 = vmul.f32 1.442695, %v362_v10  ;;  %1098 = vrot.lane.b32.xlu1 %v1095_v9, %s4411_s23 }
 0x53e   :  { %v888_v57 = vpop.xlane.xlu1 %887 }
 0x53f   :  { %4312 = vpow2.f32 %v365_v11  ;;  %v890_v35 = vsub.f32 %v880_v61, %v888_v57  ;;  %v69_v57 = vld [vmem:[%s5120_s3 + $0x38] sm:$0xff] }
 0x540   :  { %4314 = vpow2.f32 %v891_v25 }
 0x541   :  { %4316 = vpow2.f32 %v1080_v28  ;;  %v893_v38 = vmul.f32 1.442695, %v890_v35 }
 0x542   :  { %v4673_v13 = vpop.permute.xlu1 %377  ;;  %4318 = vpow2.f32 %v1078_v34 }
 0x543   :  { %v380_v15 = vmul.f32 %v4673_v13, %v4507_v24  ;;  %v381_v16 = vmul.f32 %v4673_v13, %v4505_v22  ;;  %4320 = vpow2.f32 %v893_v38 }
 0x545   :  { %1252 = vrot.lane.b32.xlu1 %v380_v15, %s4411_s23  ;;  %v67_v15 = vld [vmem:[%s5120_s3 + $0x28] sm:$0xff] }
 0x546   :  { %v4690_v39 = vpop.permute.xlu1 %905 }
 0x547   :  { %v909_v42 = vmul.f32 %v4690_v39, %v4505_v22  ;;  %v908_v48 = vmul.f32 %v4690_v39, %v4507_v24 }
 0x549   :  { %1329 = vrot.lane.b32.xlu1 %v381_v16, %s4411_s23  ;;  %v66_v16 = vld [vmem:[%s5120_s3 + $0x20] sm:$0xff] }
 0x54c   :  { %v4313_v20 = vpop.eup %4312 }
 0x54d   :  { %v370_v21 = vsel %vm354_vm2, %v4313_v20, 0.0  ;;  %v4685_v30 = vpop.eup %4314 }
 0x54e   :  { %371 = vadd.xlane.f32.xlu0 %v370_v21  ;;  %v895_v32 = vsel %vm354_vm2, %v4685_v30, 0.0  ;;  %v4317_v33 = vpop.eup %4316 }
 0x54f   :  { %v1085_v37 = vsel %vm354_vm2, %v4317_v33, 0.0  ;;  %v4319_v40 = vpop.eup %4318 }
 0x550   :  { %v1082_v43 = vsel %vm354_vm2, %v4319_v40, 0.0  ;;  %v4321_v45 = vpop.eup %4320 }
 0x551   :  { %v898_v47 = vsel %vm354_vm2, %v4321_v45, 0.0 }
 0x564   :  { %1175 = vrot.lane.b32.xlu0 %v1096_v29, %s4411_s23 }
 0x56b   :  { %v369_v50 = vpop.xlane.xlu0 %368 }
 0x56d   :  { %896 = vadd.xlane.f32.xlu1 %v895_v32 }
 0x571   :  { %1086 = vadd.xlane.f32.xlu1 %v1085_v37 }
 0x582   :  { %1483 = vrot.lane.b32.xlu1 %v909_v42, %s4411_s23 }
 0x583   :  { %1083 = vadd.xlane.f32.xlu0 %v1082_v43 }
 0x587   :  { %899 = vadd.xlane.f32.xlu0 %v898_v47 }
 0x59d   :  { %1406 = vrot.lane.b32.xlu0 %v908_v48, %s4411_s23 }
 0x5af   :  { %v1099_v49 = vpop.permute.xlu1 %1098 }
 0x5b0   :  { %4078 = vmatpush3.msra.mxu0 %v1099_v49 }
 0x5b1   :  { %4087 = vmatprep.subr.mxu0 %v4408_v18 }
 0x5b7   :  { %v1253_v53 = vpop.permute.xlu1 %1252 }
 0x5bb   :  { %v1330_v54 = vpop.permute.xlu1 %1329 }
 0x5d7   :  { %v372_v22 = vpop.xlane.xlu0 %371 }
 0x5db   :  { %v1176_v52 = vpop.permute.xlu0 %1175 }
 0x5dc   :  { %4083 = vmatpush3.msra.mxu1 %v1176_v52 }
 0x5dd   :  { %4092 = vmatprep.subr.mxu1 %v4408_v18 }
 0x5f6   :  { %v897_v55 = vpop.xlane.xlu1 %896 }
 0x5fa   :  { %v1087_v56 = vpop.xlane.xlu1 %1086 }
 0x5fb   :  { %4322 = vrcp.f32 %v1087_v56 }
 0x5fc   :  { %4324 = vrcp.f32 %v372_v22 }
 0x5fe   :  { %v1484_v1 = vpop.permute.xlu1 %1483 }
 0x608   :  { %v4323_v59 = vpop.eup %4322 }
 0x609   :  { %v1091_v24 = vmul.f32 %v4323_v59, %v4317_v33  ;;  %v4325_v61 = vpop.eup %4324 }
 0x60a   :  { %v376_v63 = vmul.f32 %v4325_v61, %v4313_v20 }
 0x60b   :  { %4085 = vmatmul.mubr.msk.f32.vlgmr.msra.gmra.mxu1 %vm354_vm2, %v1091_v24 }
 0x60c   :  { %4093 = vmatpush3.msra.mxu1 %v1330_v54  ;;  %v1084_v62 = vpop.xlane.xlu0 %1083  ;;  %4094 = vmatprep.mubr.msk.f32.mxu1 %vm4409_vm1, %v4408_v18 }
 0x60d   :  { %4326 = vrcp.f32 %v1084_v62  ;;  %4102 = vmatprep.subr.mxu1 %v4408_v18 }
 0x60e   :  { %4328 = vrcp.f32 %v369_v50 }
 0x60f   :  { %4095 = vmatmul.mubr.msk.f32.vlgmr.msra.gmra.mxu1 %vm354_vm2, %v376_v63 }
 0x610   :  { %4103 = vmatpush3.msra.mxu1 %v1484_v1  ;;  %v900_v44 = vpop.xlane.xlu0 %899  ;;  %4104 = vmatprep.mubr.msk.f32.mxu1 %vm4409_vm1, %v4408_v18  ;;  %v72_v1 = vld [vmem:[%s5120_s3 + $0x50] sm:$0xff] }
 0x611   :  { %4330 = vrcp.f32 %v900_v44  ;;  %v71_v44 = vld [vmem:[%s5120_s3 + $0x48] sm:$0xff] }
 0x612   :  { %4332 = vrcp.f32 %v897_v55 }
 0x614   :  { %v1407_v9 = vpop.permute.xlu0 %1406 }
 0x61a   :  { %v4327_v2 = vpop.eup %4326 }
 0x61b   :  { %v1090_v4 = vmul.f32 %v4327_v2, %v4319_v40  ;;  %v4329_v5 = vpop.eup %4328  ;;  %v70_v2 = vld [vmem:[%s5120_s3 + $0x40] sm:$0xff] }
 0x61c   :  { %v375_v58 = vmul.f32 %v4329_v5, %v4664_v3  ;;  %v68_v3 = vld [vmem:[%s5120_s3 + $0x30] sm:$0xff] }
 0x61d   :  { %4080 = vmatmul.mubr.msk.f32.vlgmr.msra.gmra.mxu0 %vm354_vm2, %v1090_v4  ;;  %v81_v4 = vld [vmem:[%s5120_s3 + $0x98] sm:$0xff]  ;;  %v80_v5 = vld [vmem:[%s5120_s3 + $0x90] sm:$0xff] }
 0x61e   :  { %v4331_v6 = vpop.eup %4330  ;;  %4088 = vmatpush3.msra.mxu0 %v1253_v53  ;;  %4089 = vmatprep.mubr.msk.f32.mxu0 %vm4409_vm1, %v4408_v18 }
 0x61f   :  { %4097 = vmatprep.subr.mxu0 %v4408_v18  ;;  %v904_v7 = vmul.f32 %v4331_v6, %v4321_v45  ;;  %v4333_v10 = vpop.eup %4332  ;;  %v3834_v45 = vld [vmem:[%s5121_s4 + $0x1] ss:$0 sm:$0xff]  ;;  %v79_v6 = vld [vmem:[%s5120_s3 + $0x88] sm:$0xff] }
 0x620   :  { %v903_v11 = vmul.f32 %v4333_v10, %v4685_v30 }
 0x621   :  { %4090 = vmatmul.mubr.msk.f32.vlgmr.msra.gmra.mxu0 %vm354_vm2, %v375_v58  ;;  %4105 = vmatmul.mubr.msk.f32.vlgmr.msra.gmra.mxu1 %vm354_vm2, %v904_v7  ;;  %v78_v58 = vld [vmem:[%s5120_s3 + $0x80] sm:$0xff] }
 0x622   :  { %4098 = vmatpush3.msra.mxu0 %v1407_v9  ;;  %4099 = vmatprep.mubr.msk.f32.mxu0 %vm4409_vm1, %v4408_v18 }
 0x623   :  { %4107 = vmatprep.subr.mxu0 %v69_v57 }
 0x625   :  { %4100 = vmatmul.mubr.msk.f32.vlgmr.msra.gmra.mxu0 %vm354_vm2, %v903_v11 }
 0x626   :  { %4108 = vmatpush3.msra.mxu0 %v69_v57 }
 0x627   :  { %4109 = vmatprep.subr.mxu0 %v68_v3 }
 0x628   :  { %4110 = vmatpush3.msra.mxu0 %v68_v3 }
 0x629   :  { %4111 = vmatprep.subr.mxu0 %v67_v15 }
 0x62a   :  { %4112 = vmatpush3.msra.mxu0 %v67_v15 }
 0x62b   :  { %4113 = vmatprep.subr.mxu0 %v66_v16 }
 0x62c   :  { %4114 = vmatpush3.msra.mxu0 %v66_v16  ;;  %v3837_v16 = vld [vmem:[%s5121_s4 + $0x2] ss:$0 sm:$0xff] }
 0x62d   :  { %4129 = vmatprep.subr.mxu0 %v81_v4 }
 0x6cb   :  { %v1247_v20 = vpop.f32.mrf.mxu1 }
 0x6cd   :  { %v4086_v21 = vpop.f32.mrf.mxu1 }
 0x6ce   :  { %v3838_v21 = vld [vmem:[%s5121_s4 + $0x3] ss:$0 sm:$0xff] }
 0x6cf   :  { %v1401_v23 = vpop.f32.mrf.mxu1 }
 0x6d0   :  { %v1402_v38 = vadd.f32 %v1401_v23, %v4642_v36 }
 0x6d1   :  { %v4096_v25 = vpop.f32.mrf.mxu1 }
 0x6dd   :  { %v1170_v27 = vpop.f32.mrf.mxu0 }
 0x6df   :  { %v4081_v28 = vpop.f32.mrf.mxu0 }
 0x6e1   :  { %v1324_v29 = vpop.f32.mrf.mxu0  ;;  %v1555_v30 = vpop.f32.mrf.mxu1 }
 0x6e2   :  { %v1556_v33 = vadd.f32 %v1555_v30, %v1247_v20  ;;  %v1325_v35 = vadd.f32 %v1324_v29, %v4644_v41 }
 0x6e3   :  { %v4091_v31 = vpop.f32.mrf.mxu0  ;;  %v4106_v32 = vpop.f32.mrf.mxu1 }
 0x6e4   :  { %v1560_v43 = vadd.f32 %v1556_v33, %v1402_v38  ;;  %v77_v31 = vld [vmem:[%s5120_s3 + $0x78] sm:$0xff]  ;;  %v76_v32 = vld [vmem:[%s5120_s3 + $0x70] sm:$0xff]  ;;  %v75_v33 = vld [vmem:[%s5120_s3 + $0x68] sm:$0xff] }
 0x6e5   :  { %v1478_v34 = vpop.f32.mrf.mxu0 }
 0x6e6   :  { %v1479_v37 = vadd.f32 %v1478_v34, %v1170_v27  ;;  %v74_v34 = vld [vmem:[%s5120_s3 + $0x60] sm:$0xff] }
 0x6e7   :  { %v4101_v40 = vpop.f32.mrf.mxu0 }
 0x6e8   :  { %v1559_v42 = vadd.f32 %v1479_v37, %v1325_v35  ;;  %v3839_v35 = vld [vmem:[%s5121_s4 + $0x4] ss:$0 sm:$0xff] }
 0x6ea   :  { %4115 = vmatprep.mubr.msk.f32.mxu0 %vm94_vm0, %v1559_v42 }
 0x6eb   :  { %4116 = vmatmul.mubr.msk.f32.vlgmr.msra.gmra.mxu0 %vm94_vm0, %v1560_v43 }
 0x6ec   :  { %4130 = vmatpush3.msra.mxu0 %v81_v4  ;;  %v1900_v4 = vld [vmem:[%s5120_s3 + $0xa0] sm:$0xff] }
 0x6ed   :  { %4131 = vmatprep.subr.mxu0 %v80_v5 }
 0x6ee   :  { %4132 = vmatpush3.msra.mxu0 %v80_v5 }
 0x6ef   :  { %4133 = vmatprep.subr.mxu0 %v79_v6 }
 0x6f0   :  { %4134 = vmatpush3.msra.mxu0 %v79_v6 }
 0x6f1   :  { %4135 = vmatprep.subr.mxu0 %v78_v58 }
 0x6f2   :  { %4136 = vmatpush3.msra.mxu0 %v78_v58 }
 0x6f3   :  { %4137 = vmatprep.subr.mxu0 %v77_v31 }
 0x6f4   :  { %4138 = vmatpush3.msra.mxu0 %v77_v31 }
 0x6f5   :  { %4139 = vmatprep.subr.mxu0 %v76_v32 }
 0x6f6   :  { %4140 = vmatpush3.msra.mxu0 %v76_v32 }
 0x6f7   :  { %4141 = vmatprep.subr.mxu0 %v75_v33 }
 0x6f8   :  { %4142 = vmatpush3.msra.mxu0 %v75_v33 }
 0x6f9   :  { %4143 = vmatprep.subr.mxu0 %v74_v34 }
 0x6fa   :  { %4144 = vmatpush3.msra.mxu0 %v74_v34 }
 0x6fb   :  { %4169 = vmatprep.subr.mxu0 %v4408_v18 }
 0x7ab   :  { %v4117_v47 = vpop.f32.mrf.mxu0 }
 0x7ac   :  { %v1643_v48 = vadd.f32 %v4117_v47, %v3834_v45  ;;  %v3842_v47 = vld [vmem:[%s5121_s4 + $0x5] ss:$0 sm:$0xff] }
 0x7ad   :  { %v1637_v49 = vpop.f32.mrf.mxu0 }
 0x7ae   :  { %v1638_v50 = vadd.f32 %v3834_v45, %v1637_v49  ;;  %v1647_v41 = vadd.f32 %v1643_v48, %v4490_v17 }
 0x7b0   :  { %v1651_v22 = vsel %vm94_vm0, %v1647_v41, 0.0  ;;  %v1646_v36 = vadd.f32 %v1638_v50, %v4483_v14  ;;  %v73_v14 = vld [vmem:[%s5120_s3 + $0x58] sm:$0xff] }
 0x7b1   :  { %1652 = vadd.xlane.f32.xlu1 %v1651_v22  ;;  %4118 = vmatprep.subr.mxu1 %v73_v14 }
 0x7b2   :  { %v1648_v52 = vsel %vm94_vm0, %v1646_v36, 0.0  ;;  %4119 = vmatpush3.msra.mxu1 %v73_v14 }
 0x7b3   :  { %1649 = vadd.xlane.f32.xlu0 %v1648_v52  ;;  %4120 = vmatprep.subr.mxu1 %v72_v1 }
 0x7b4   :  { %4121 = vmatpush3.msra.mxu1 %v72_v1  ;;  %v1903_v1 = vld [vmem:[%s5120_s3 + $0xb8] sm:$0xff] }
 0x7b5   :  { %4122 = vmatprep.subr.mxu1 %v71_v44 }
 0x7b6   :  { %4123 = vmatpush3.msra.mxu1 %v71_v44  ;;  %v1902_v44 = vld [vmem:[%s5120_s3 + $0xb0] sm:$0xff] }
 0x7b7   :  { %4124 = vmatprep.subr.mxu1 %v70_v2 }
 0x7b8   :  { %4125 = vmatpush3.msra.mxu1 %v70_v2  ;;  %v1901_v2 = vld [vmem:[%s5120_s3 + $0xa8] sm:$0xff] }
 0x7b9   :  { %4148 = vmatprep.subr.mxu1 %v1903_v1 }
 0x83a   :  { %v1653_v53 = vpop.xlane.xlu1 %1652 }
 0x83b   :  { %v1656_v54 = vmul.f32 0.03125, %v1653_v53 }
 0x83c   :  { %v1650_v55 = vpop.xlane.xlu0 %1649 }
 0x83d   :  { %v1655_v56 = vmul.f32 0.03125, %v1650_v55  ;;  %v1658_v59 = vsub.f32 %v1647_v41, %v1656_v54 }
 0x83f   :  { %v1657_v24 = vsub.f32 %v1646_v36, %v1655_v56  ;;  %v1660_v63 = vmul.f32 %v1658_v59, %v1658_v59 }
 0x841   :  { %v1659_v61 = vmul.f32 %v1657_v24, %v1657_v24  ;;  %v1664_v17 = vsel %vm94_vm0, %v1660_v63, 0.0 }
 0x843   :  { %v1661_v62 = vsel %vm94_vm0, %v1659_v61, 0.0 }
 0x844   :  { %1662 = vadd.xlane.f32.xlu0 %v1661_v62 }
 0x848   :  { %1665 = vadd.xlane.f32.xlu0 %v1664_v17 }
 0x8cd   :  { %v1663_v7 = vpop.xlane.xlu0 %1662 }
 0x8ce   :  { %v1667_v10 = vmul.f32 0.03125, %v1663_v7 }
 0x8d0   :  { %v1669_v9 = vadd.f32 1e-05, %v1667_v10 }
 0x8d1   :  { %v1666_v11 = vpop.xlane.xlu0 %1665 }
 0x8d2   :  { %4334 = vrsqrt.f32 %v1669_v9  ;;  %v1668_v57 = vmul.f32 0.03125, %v1666_v11 }
 0x8d4   :  { %v1670_v3 = vadd.f32 1e-05, %v1668_v57  ;;  %v3845_v57 = vld [vmem:[%s5121_s4 + $0x6] ss:$0 sm:$0xff] }
 0x8d6   :  { %4336 = vrsqrt.f32 %v1670_v3 }
 0x8df   :  { %v4335_v15 = vpop.eup %4334 }
 0x8e0   :  { %v1673_v20 = vmul.f32 %v4335_v15, %v1657_v24 }
 0x8e2   :  { %v1679_v23 = vmul.f32 %v3837_v16, %v1673_v20 }
 0x8e3   :  { %v4337_v25 = vpop.eup %4336 }
 0x8e4   :  { %v1674_v27 = vmul.f32 %v4337_v25, %v1658_v59  ;;  %v1685_v28 = vadd.f32 %v3838_v21, %v1679_v23 }
 0x8e6   :  { %v1680_v29 = vmul.f32 %v3837_v16, %v1674_v27  ;;  %4126 = vmatprep.mubr.msk.f32.mxu1 %vm94_vm0, %v1685_v28 }
 0x8e8   :  { %v1686_v30 = vadd.f32 %v3838_v21, %v1680_v29  ;;  %v3846_v21 = vld [vmem:[%s5121_s4 + $0x7] ss:$0 sm:$0xff] }
 0x8ea   :  { %4127 = vmatmul.mubr.msk.f32.vlgmr.msra.gmra.mxu1 %vm94_vm0, %v1686_v30 }
 0x8eb   :  { %4149 = vmatpush3.msra.mxu1 %v1903_v1 }
 0x8ec   :  { %4150 = vmatprep.subr.mxu1 %v1902_v44 }
 0x8ed   :  { %4151 = vmatpush3.msra.mxu1 %v1902_v44 }
 0x8ee   :  { %4152 = vmatprep.subr.mxu1 %v1901_v2 }
 0x8ef   :  { %4153 = vmatpush3.msra.mxu1 %v1901_v2 }
 0x8f0   :  { %4154 = vmatprep.subr.mxu1 %v1900_v4 }
 0x8f1   :  { %4155 = vmatpush3.msra.mxu1 %v1900_v4 }
 0x8f2   :  { %4159 = vmatprep.subr.mxu1 %v4408_v18 }
 0x9aa   :  { %v4128_v37 = vpop.f32.mrf.mxu1 }
 0x9ab   :  { %v1769_v38 = vadd.f32 %v4128_v37, %v3839_v35 }
 0x9ac   :  { %v1763_v40 = vpop.f32.mrf.mxu1 }
 0x9ad   :  { %v1764_v42 = vadd.f32 %v3839_v35, %v1763_v40  ;;  %v1773_v45 = vmax.f32 %v1769_v38, 0.0 }
 0x9af   :  { %v1772_v43 = vmax.f32 %v1764_v42, 0.0 }
 0x9b1   :  { %4145 = vmatprep.mubr.msk.f32.mxu0 %vm1778_vm3, %v1772_v43 }
 0x9b2   :  { %4146 = vmatmul.mubr.msk.f32.vlgmr.msra.gmra.mxu0 %vm1778_vm3, %v1773_v45 }
 0x9b3   :  { %4171 = vmatprep.mubr.msk.f32.mxu0 %vm4409_vm1, %v4408_v18 }
 0xa72   :  { %v4147_v48 = vpop.f32.mrf.mxu0 }
 0xa73   :  { %v1857_v49 = vadd.f32 %v4147_v48, %v3842_v47 }
 0xa74   :  { %v1851_v50 = vpop.f32.mrf.mxu0 }
 0xa75   :  { %v1852_v41 = vadd.f32 %v3842_v47, %v1851_v50  ;;  %v1861_v22 = vadd.f32 %v1857_v49, %v1686_v30 }
 0xa77   :  { %v1865_v36 = vsel %vm94_vm0, %v1861_v22, 0.0  ;;  %v1860_v52 = vadd.f32 %v1852_v41, %v1685_v28  ;;  %v3847_v28 = vld [vmem:[%s5121_s4 + $0x8] ss:$0 sm:$0xff] }
 0xa78   :  { %1866 = vadd.xlane.f32.xlu0 %v1865_v36 }
 0xa79   :  { %v1862_v53 = vsel %vm94_vm0, %v1860_v52, 0.0 }
 0xa7a   :  { %1863 = vadd.xlane.f32.xlu1 %v1862_v53 }
 0xb01   :  { %v1867_v54 = vpop.xlane.xlu0 %1866 }
 0xb02   :  { %v1869_v55 = vmul.f32 0.03125, %v1867_v54 }
 0xb03   :  { %v1864_v56 = vpop.xlane.xlu1 %1863 }
 0xb04   :  { %v1871_v59 = vsub.f32 %v1861_v22, %v1869_v55  ;;  %v1868_v24 = vmul.f32 0.03125, %v1864_v56 }
 0xb06   :  { %v1870_v61 = vsub.f32 %v1860_v52, %v1868_v24  ;;  %v1873_v62 = vmul.f32 %v1871_v59, %v1871_v59 }
 0xb08   :  { %v1877_v63 = vsel %vm94_vm0, %v1873_v62, 0.0  ;;  %v1872_v17 = vmul.f32 %v1870_v61, %v1870_v61 }
 0xb09   :  { %1878 = vadd.xlane.f32.xlu0 %v1877_v63 }
 0xb0a   :  { %v1874_v14 = vsel %vm94_vm0, %v1872_v17, 0.0 }
 0xb0b   :  { %1875 = vadd.xlane.f32.xlu1 %v1874_v14 }
 0xb92   :  { %v1879_v5 = vpop.xlane.xlu0 %1878 }
 0xb93   :  { %v1881_v6 = vmul.f32 0.03125, %v1879_v5 }
 0xb94   :  { %v1876_v58 = vpop.xlane.xlu1 %1875 }
 0xb95   :  { %v1883_v7 = vadd.f32 1e-05, %v1881_v6  ;;  %v1880_v10 = vmul.f32 0.03125, %v1876_v58 }
 0xb97   :  { %4338 = vrsqrt.f32 %v1883_v7  ;;  %v1882_v9 = vadd.f32 1e-05, %v1880_v10 }
 0xb99   :  { %4340 = vrsqrt.f32 %v1882_v9 }
 0xba4   :  { %v4339_v11 = vpop.eup %4338 }
 0xba5   :  { %v1887_v3 = vmul.f32 %v4339_v11, %v1871_v59 }
 0xba6   :  { %v4341_v15 = vpop.eup %4340 }
 0xba7   :  { %v1886_v16 = vmul.f32 %v4341_v15, %v1870_v61  ;;  %v1893_v20 = vmul.f32 %v3845_v57, %v1887_v3 }
 0xba9   :  { %v1892_v23 = vmul.f32 %v3845_v57, %v1886_v16  ;;  %v4825_v27 = vadd.f32 %v3846_v21, %v1893_v20 }
 0xbab   :  { %v4823_v25 = vadd.f32 %v3846_v21, %v1892_v23 }
 0xbad   :  { %4156 = vmatprep.mubr.msk.f32.mxu1 %vm94_vm0, %v4823_v25 }
 0xbae   :  { %4157 = vmatmul.mubr.msk.f32.vlgmr.msra.gmra.mxu1 %vm94_vm0, %v4825_v27 }
 0xbaf   :  { %4161 = vmatprep.mubr.msk.f32.mxu1 %vm4409_vm1, %v4408_v18 }
 0xc6e   :  { %v4158_v29 = vpop.f32.mrf.mxu1 }
 0xc6f   :  { %v4836_v30 = vadd.f32 %v4158_v29, %v3847_v28 }
 0xc70   :  { %v2004_v31 = vpop.f32.mrf.mxu1 }
 0xc71   :  { %v4838_v32 = vadd.f32 %v3847_v28, %v2004_v31  ;;  %v2014_v33 = vmul.f32 %v4836_v30, %v4500_v19  ;;  %v2196_v37 = vmul.f32 %v4836_v30, %v4511_v26  ;;  %v2526_v56 = vmul.f32 %v4836_v30, %v4587_v0 }
 0xc72   :  { %v2702_v59 = vmul.f32 %v4836_v30, %v4596_v12  ;;  %v2370_v5 = vmul.f32 %v4836_v30, %v4579_v60 }
 0xc73   :  { %2094 = vrot.lane.b32.xlu0 %v2014_v33, %s4410_s17  ;;  %v2013_v34 = vmul.f32 %v4838_v32, %v4500_v19  ;;  %v2195_v35 = vmul.f32 %v4838_v32, %v4511_v26  ;;  %v2369_v54 = vmul.f32 %v4838_v32, %v4579_v60  ;;  %v2525_v55 = vmul.f32 %v4838_v32, %v4587_v0 }
 0xc74   :  { %v2701_v6 = vmul.f32 %v4838_v32, %v4596_v12 }
 0xc75   :  { %2016 = vrot.lane.b32.xlu1 %v2013_v34, %s4410_s17 }
 0xc79   :  { %2198 = vrot.lane.b32.xlu1 %v2195_v35, %s4410_s17 }
 0xc7d   :  { %2273 = vrot.lane.b32.xlu1 %v2196_v37, %s4410_s17 }
 0xce5   :  { %v2095_v40 = vpop.permute.xlu0 %2094 }
 0xce7   :  { %v2017_v38 = vpop.permute.xlu1 %2016 }
 0xce8   :  { %4160 = vmatpush3.xpose.msk.msra.mxu1 %vm94_vm0, %v2017_v38 }
 0xce9   :  { %4164 = vmatprep.subr.mxu1 %v4408_v18 }
 0xceb   :  { %4162 = vmatmul.mubr.msk.f32.vlgmr.msra.gmra.mxu1 %vm94_vm0, %v4838_v32  ;;  %v2199_v19 = vpop.permute.xlu1 %2198 }
 0xcec   :  { %4165 = vmatpush3.xpose.msk.msra.mxu1 %vm94_vm0, %v2095_v40  ;;  %4170 = vmatpush3.xpose.msk.msra.mxu0 %vm94_vm0, %v2199_v19 }
 0xced   :  { %4166 = vmatprep.mubr.msk.f32.mxu1 %vm4409_vm1, %v4408_v18  ;;  %4174 = vmatprep.subr.mxu1 %v4408_v18 }
 0xcee   :  { %4179 = vmatprep.subr.mxu0 %v4408_v18 }
 0xcef   :  { %4167 = vmatmul.mubr.msk.f32.vlgmr.msra.gmra.mxu1 %vm94_vm0, %v4836_v30  ;;  %4172 = vmatmul.mubr.msk.f32.vlgmr.msra.gmra.mxu0 %vm94_vm0, %v4838_v32  ;;  %v2274_v26 = vpop.permute.xlu1 %2273 }
 0xcf0   :  { %4175 = vmatpush3.xpose.msk.msra.mxu1 %vm94_vm0, %v2274_v26  ;;  %4176 = vmatprep.mubr.msk.f32.mxu1 %vm4409_vm1, %v4408_v18 }
 0xcf1   :  { %4184 = vmatprep.subr.mxu1 %v4408_v18  ;;  %4181 = vmatprep.mubr.msk.f32.mxu0 %vm4409_vm1, %v4408_v18 }
 0xcf3   :  { %4177 = vmatmul.mubr.msk.f32.vlgmr.msra.gmra.mxu1 %vm94_vm0, %v4836_v30 }
 0xcf4   :  { %4186 = vmatprep.mubr.msk.f32.mxu1 %vm4409_vm1, %v4408_v18 }
 0xdab   :  { %v4876_v42 = vpop.f32.mrf.mxu1 }
 0xdac   :  { %v2090_v40 = vadd.f32 %v4876_v42, %v4555_v46 }
 0xdad   :  { %v4163_v43 = vpop.f32.mrf.mxu1 }
 0xdaf   :  { %v4878_v45 = vpop.f32.mrf.mxu1  ;;  %v2268_v47 = vpop.f32.mrf.mxu0 }
 0xdb0   :  { %v2269_v48 = vadd.f32 %v2268_v47, %v4555_v46 }
 0xdb1   :  { %v4168_v49 = vpop.f32.mrf.mxu1  ;;  %v4173_v50 = vpop.f32.mrf.mxu0 }
 0xdb2   :  { %v2347_v41 = vsel %vm354_vm2, %v2269_v48, -inf  ;;  %v2171_v50 = vsel %vm354_vm2, %v2090_v40, -inf }
 0xdb3   :  { %2348 = vmax.xlane.f32.xlu0 %v2347_v41  ;;  %v2343_v22 = vpop.f32.mrf.mxu1 }
 0xdb4   :  { %v2344_v36 = vadd.f32 %v2343_v22, %v4558_v51 }
 0xdb5   :  { %v4178_v52 = vpop.f32.mrf.mxu1 }
 0xdb6   :  { %v2350_v53 = vsel %vm354_vm2, %v2344_v36, -inf }
 0xdb7   :  { %2351 = vmax.xlane.f32.xlu1 %v2350_v53 }
 0xdc8   :  { %2372 = vrot.lane.b32.xlu1 %v2369_v54, %s4411_s23 }
 0xdcc   :  { %2528 = vrot.lane.b32.xlu1 %v2525_v55, %s4410_s17 }
 0xdd0   :  { %2603 = vrot.lane.b32.xlu1 %v2526_v56, %s4410_s17 }
 0xdd4   :  { %2779 = vrot.lane.b32.xlu1 %v2702_v59, %s4410_s17 }
 0xe3c   :  { %v2349_v24 = vpop.xlane.xlu0 %2348 }
 0xe3d   :  { %v2353_v61 = vsub.f32 %v2269_v48, %v2349_v24  ;;  %v2168_v48 = vadd.f32 %v4878_v45, %v4558_v51 }
 0xe3f   :  { %v2355_v62 = vmul.f32 1.442695, %v2353_v61  ;;  %v2174_v22 = vsel %vm354_vm2, %v2168_v48, -inf }
 0xe40   :  { %v2352_v63 = vpop.xlane.xlu1 %2351 }
 0xe41   :  { %4342 = vpow2.f32 %v2355_v62  ;;  %v2354_v17 = vsub.f32 %v2344_v36, %v2352_v63 }
 0xe43   :  { %v2357_v14 = vmul.f32 1.442695, %v2354_v17 }
 0xe44   :  { %v2373_v1 = vpop.permute.xlu1 %2372 }
 0xe45   :  { %4344 = vpow2.f32 %v2357_v14  ;;  %4180 = vmatpush3.msra.mxu0 %v2373_v1 }
 0xe46   :  { %4189 = vmatprep.subr.mxu0 %v4408_v18 }
 0xe48   :  { %v2529_v9 = vpop.permute.xlu1 %2528 }
 0xe4c   :  { %v2604_v12 = vpop.permute.xlu1 %2603 }
 0xe4e   :  { %v4343_v0 = vpop.eup %4342 }
 0xe4f   :  { %v2359_v44 = vsel %vm354_vm2, %v4343_v0, 0.0 }
 0xe50   :  { %2360 = vadd.xlane.f32.xlu0 %v2359_v44  ;;  %v2780_v16 = vpop.permute.xlu1 %2779 }
 0xe52   :  { %v4345_v2 = vpop.eup %4344 }
 0xe53   :  { %v2362_v4 = vsel %vm354_vm2, %v4345_v2, 0.0 }
 0xe54   :  { %2363 = vadd.xlane.f32.xlu0 %v2362_v4 }
 0xe6a   :  { %2449 = vrot.lane.b32.xlu0 %v2370_v5, %s4411_s23 }
 0xe6e   :  { %2704 = vrot.lane.b32.xlu0 %v2701_v6, %s4410_s17 }
 0xed9   :  { %v2361_v58 = vpop.xlane.xlu0 %2360 }
 0xeda   :  { %4346 = vrcp.f32 %v2361_v58  ;;  %v2875_v58 = vmul.f32 %v4838_v32, %v4668_v8 }
 0xedd   :  { %v2364_v7 = vpop.xlane.xlu0 %2363 }
 0xede   :  { %4348 = vrcp.f32 %v2364_v7 }
 0xee1   :  { %v2450_v10 = vpop.permute.xlu0 %2449 }
 0xee2   :  { %4185 = vmatpush3.msra.mxu1 %v2450_v10 }
 0xee3   :  { %4194 = vmatprep.subr.mxu1 %v4408_v18 }
 0xee5   :  { %v2705_v15 = vpop.permute.xlu0 %2704 }
 0xee7   :  { %v4347_v11 = vpop.eup %4346 }
 0xee8   :  { %v2367_v57 = vmul.f32 %v4347_v11, %v4343_v0 }
 0xeea   :  { %4182 = vmatmul.mubr.msk.f32.vlgmr.msra.gmra.mxu0 %vm354_vm2, %v2367_v57  ;;  %v2876_v57 = vmul.f32 %v4836_v30, %v4668_v8  ;;  %v2193_v8 = vmul.f32 %v4838_v32, %v4673_v13 }
 0xeeb   :  { %v4349_v60 = vpop.eup %4348  ;;  %4190 = vmatpush3.xpose.msk.msra.mxu0 %vm94_vm0, %v2529_v9  ;;  %4191 = vmatprep.mubr.msk.f32.mxu0 %vm4409_vm1, %v4408_v18 }
 0xeec   :  { %4199 = vmatprep.subr.mxu0 %v4408_v18  ;;  %v2368_v3 = vmul.f32 %v4349_v60, %v4345_v2 }
 0xeee   :  { %4187 = vmatmul.mubr.msk.f32.vlgmr.msra.gmra.mxu1 %vm354_vm2, %v2368_v3  ;;  %4192 = vmatmul.mubr.msk.f32.vlgmr.msra.gmra.mxu0 %vm94_vm0, %v4838_v32 }
 0xeef   :  { %4195 = vmatpush3.xpose.msk.msra.mxu1 %vm94_vm0, %v2604_v12  ;;  %4200 = vmatpush3.xpose.msk.msra.mxu0 %vm94_vm0, %v2705_v15  ;;  %v2699_v12 = vmul.f32 %v4838_v32, %v4690_v39 }
 0xef0   :  { %4196 = vmatprep.mubr.msk.f32.mxu1 %vm4409_vm1, %v4408_v18  ;;  %4201 = vmatprep.mubr.msk.f32.mxu0 %vm4409_vm1, %v4408_v18 }
 0xef1   :  { %4204 = vmatprep.subr.mxu1 %v4408_v18  ;;  %4209 = vmatprep.subr.mxu0 %v4408_v18 }
 0xef2   :  { %4197 = vmatmul.mubr.msk.f32.vlgmr.msra.gmra.mxu1 %vm94_vm0, %v4836_v30  ;;  %4202 = vmatmul.mubr.msk.f32.vlgmr.msra.gmra.mxu0 %vm94_vm0, %v4838_v32 }
 0xef3   :  { %4205 = vmatpush3.xpose.msk.msra.mxu1 %vm94_vm0, %v2780_v16  ;;  %4206 = vmatprep.mubr.msk.f32.mxu1 %vm4409_vm1, %v4408_v18 }
 0xef4   :  { %4214 = vmatprep.subr.mxu1 %v4408_v18  ;;  %4211 = vmatprep.mubr.msk.f32.mxu0 %vm4409_vm1, %v4408_v18 }
 0xef6   :  { %4207 = vmatmul.mubr.msk.f32.vlgmr.msra.gmra.mxu1 %vm94_vm0, %v4836_v30 }
 0xef7   :  { %4216 = vmatprep.mubr.msk.f32.mxu1 %vm4409_vm1, %v4408_v18 }
 0xfaa   :  { %v4936_v20 = vpop.f32.mrf.mxu0 }
 0xfac   :  { %v4183_v21 = vpop.f32.mrf.mxu0 }
 0xfae   :  { %v4938_v23 = vpop.f32.mrf.mxu1  ;;  %v2598_v28 = vpop.f32.mrf.mxu0 }
 0xfaf   :  { %v2599_v49 = vadd.f32 %v2598_v28, %v4555_v46  ;;  %v2194_v28 = vmul.f32 %v4836_v30, %v4673_v13 }
 0xfb0   :  { %v4188_v29 = vpop.f32.mrf.mxu1  ;;  %v4193_v31 = vpop.f32.mrf.mxu0 }
 0xfb1   :  { %v2677_v36 = vsel %vm354_vm2, %v2599_v49, -inf  ;;  %v2700_v29 = vmul.f32 %v4836_v30, %v4690_v39 }
 0xfb2   :  { %v2673_v33 = vpop.f32.mrf.mxu1  ;;  %v2774_v34 = vpop.f32.mrf.mxu0 }
 0xfb3   :  { %v2775_v35 = vadd.f32 %v2774_v34, %v4555_v46  ;;  %v2674_v42 = vadd.f32 %v2673_v33, %v4558_v51 }
 0xfb4   :  { %v4198_v37 = vpop.f32.mrf.mxu1  ;;  %v4203_v38 = vpop.f32.mrf.mxu0 }
 0xfb5   :  { %v2853_v19 = vsel %vm354_vm2, %v2775_v35, -inf  ;;  %v2680_v52 = vsel %vm354_vm2, %v2674_v42, -inf }
 0xfb6   :  { %2854 = vmax.xlane.f32.xlu0 %v2853_v19  ;;  %v2849_v26 = vpop.f32.mrf.mxu1 }
 0xfb7   :  { %v2850_v43 = vadd.f32 %v2849_v26, %v4558_v51 }
 0xfb8   :  { %v4208_v47 = vpop.f32.mrf.mxu1 }
 0xfb9   :  { %v2856_v41 = vsel %vm354_vm2, %v2850_v43, -inf }
 0xfba   :  { %2172 = vmax.xlane.f32.xlu0 %v2171_v50  ;;  %2857 = vmax.xlane.f32.xlu1 %v2856_v41 }
 0xfbe   :  { %2175 = vmax.xlane.f32.xlu0 %v2174_v22  ;;  %2678 = vmax.xlane.f32.xlu1 %v2677_v36 }
 0xfc2   :  { %2681 = vmax.xlane.f32.xlu0 %v2680_v52 }
0x103f   :  { %v2855_v45 = vpop.xlane.xlu0 %2854 }
0x1040   :  { %v2859_v9 = vsub.f32 %v2775_v35, %v2855_v45 }
0x1042   :  { %v2861_v60 = vmul.f32 1.442695, %v2859_v9 }
0x1043   :  { %v2173_v53 = vpop.xlane.xlu0 %2172  ;;  %v2858_v55 = vpop.xlane.xlu1 %2857 }
0x1044   :  { %v2177_v46 = vsub.f32 %v2090_v40, %v2173_v53  ;;  %v2860_v24 = vsub.f32 %v2850_v43, %v2858_v55  ;;  %v1907_v53 = vld [vmem:[%s5120_s3 + $0xd8] sm:$0xff] }
0x1046   :  { %v2179_v54 = vmul.f32 1.442695, %v2177_v46  ;;  %v2863_v63 = vmul.f32 1.442695, %v2860_v24  ;;  %v1906_v46 = vld [vmem:[%s5120_s3 + $0xd0] sm:$0xff] }
0x1047   :  { %v2176_v56 = vpop.xlane.xlu0 %2175  ;;  %v2679_v7 = vpop.xlane.xlu1 %2678 }
0x1048   :  { %4350 = vpow2.f32 %v2179_v54  ;;  %v2178_v59 = vsub.f32 %v2168_v48, %v2176_v56  ;;  %v2683_v10 = vsub.f32 %v2599_v49, %v2679_v7  ;;  %v1905_v54 = vld [vmem:[%s5120_s3 + $0xc8] sm:$0xff] }
0x1049   :  { %v3874_v7 = vld [vmem:[%s5121_s4 + $0x9] ss:$0 sm:$0xff] }
0x104a   :  { %v2181_v61 = vmul.f32 1.442695, %v2178_v59  ;;  %v2685_v11 = vmul.f32 1.442695, %v2683_v10 }
0x104b   :  { %v2682_v51 = vpop.xlane.xlu0 %2681 }
0x104c   :  { %4352 = vpow2.f32 %v2181_v61  ;;  %v2684_v62 = vsub.f32 %v2674_v42, %v2682_v51 }
0x104e   :  { %v2687_v17 = vmul.f32 1.442695, %v2684_v62 }
0x1050   :  { %4354 = vpow2.f32 %v2687_v17 }
0x1051   :  { %4356 = vpow2.f32 %v2863_v63 }
0x1052   :  { %4358 = vpow2.f32 %v2685_v11 }
0x1053   :  { %4360 = vpow2.f32 %v2861_v60 }
0x1055   :  { %v4954_v14 = vpop.eup %4350 }
0x1056   :  { %v2183_v1 = vsel %vm354_vm2, %v4954_v14, 0.0 }
0x1057   :  { %2184 = vadd.xlane.f32.xlu1 %v2183_v1 }
0x1059   :  { %v4353_v0 = vpop.eup %4352 }
0x105a   :  { %v2186_v44 = vsel %vm354_vm2, %v4353_v0, 0.0 }
0x105b   :  { %2187 = vadd.xlane.f32.xlu0 %v2186_v44 }
0x105d   :  { %v4959_v2 = vpop.eup %4354 }
0x105e   :  { %v2692_v4 = vsel %vm354_vm2, %v4959_v2, 0.0  ;;  %v4357_v5 = vpop.eup %4356 }
0x105f   :  { %2693 = vadd.xlane.f32.xlu0 %v2692_v4  ;;  %v2868_v6 = vsel %vm354_vm2, %v4357_v5, 0.0  ;;  %v4359_v3 = vpop.eup %4358 }
0x1060   :  { %v2689_v15 = vsel %vm354_vm2, %v4359_v3, 0.0  ;;  %v4361_v16 = vpop.eup %4360 }
0x1061   :  { %v2865_v21 = vsel %vm354_vm2, %v4361_v16, 0.0 }
0x1063   :  { %2869 = vadd.xlane.f32.xlu0 %v2868_v6 }
0x1068   :  { %2878 = vrot.lane.b32.xlu1 %v2875_v58, %s4411_s23 }
0x1079   :  { %2955 = vrot.lane.b32.xlu0 %v2876_v57, %s4411_s23 }
0x107d   :  { %3186 = vrot.lane.b32.xlu0 %v2699_v12, %s4411_s23 }
0x108c   :  { %2690 = vadd.xlane.f32.xlu1 %v2689_v15 }
0x1090   :  { %2866 = vadd.xlane.f32.xlu1 %v2865_v21 }
0x10a1   :  { %3032 = vrot.lane.b32.xlu1 %v2193_v8, %s4411_s23 }
0x10a5   :  { %3109 = vrot.lane.b32.xlu1 %v2194_v28, %s4411_s23 }
0x10a9   :  { %3263 = vrot.lane.b32.xlu1 %v2700_v29, %s4411_s23 }
0x10e0   :  { %v2185_v31 = vpop.xlane.xlu1 %2184 }
0x10e4   :  { %v2188_v33 = vpop.xlane.xlu0 %2187  ;;  %v2879_v34 = vpop.permute.xlu1 %2878 }
0x10e5   :  { %4210 = vmatpush3.msra.mxu0 %v2879_v34  ;;  %v1910_v34 = vld [vmem:[%s5120_s3 + $0xf0] sm:$0xff] }
0x10e6   :  { %4219 = vmatprep.subr.mxu0 %v4408_v18 }
0x10e8   :  { %v2694_v35 = vpop.xlane.xlu0 %2693 }
0x10ec   :  { %v2870_v32 = vpop.xlane.xlu0 %2869 }
0x10ed   :  { %4362 = vrcp.f32 %v2870_v32  ;;  %v1908_v32 = vld [vmem:[%s5120_s3 + $0xe0] sm:$0xff] }
0x10ee   :  { %4364 = vrcp.f32 %v2188_v33 }
0x10ef   :  { %4366 = vrcp.f32 %v2694_v35  ;;  %v1909_v35 = vld [vmem:[%s5120_s3 + $0xe8] sm:$0xff] }
0x10f0   :  { %v2956_v37 = vpop.permute.xlu0 %2955 }
0x10f1   :  { %4215 = vmatpush3.msra.mxu1 %v2956_v37  ;;  %v1919_v37 = vld [vmem:[%s5120_s3 + $0x138] sm:$0xff] }
0x10f2   :  { %4224 = vmatprep.subr.mxu1 %v4408_v18 }
0x10f4   :  { %v3187_v52 = vpop.permute.xlu0 %3186 }
0x10fa   :  { %v4363_v13 = vpop.eup %4362 }
0x10fb   :  { %v2874_v38 = vmul.f32 %v4363_v13, %v4357_v5  ;;  %v4365_v19 = vpop.eup %4364  ;;  %v1918_v13 = vld [vmem:[%s5120_s3 + $0x130] sm:$0xff] }
0x10fc   :  { %v2192_v43 = vmul.f32 %v4365_v19, %v4353_v0  ;;  %v4367_v47 = vpop.eup %4366 }
0x10fd   :  { %4217 = vmatmul.mubr.msk.f32.vlgmr.msra.gmra.mxu1 %vm354_vm2, %v2874_v38  ;;  %v2698_v49 = vmul.f32 %v4367_v47, %v4959_v2  ;;  %v1917_v38 = vld [vmem:[%s5120_s3 + $0x128] sm:$0xff] }
0x10fe   :  { %4226 = vmatprep.mubr.msk.f32.mxu1 %vm4409_vm1, %v4408_v18 }
0x1115   :  { %v2691_v39 = vpop.xlane.xlu1 %2690 }
0x1119   :  { %v2867_v30 = vpop.xlane.xlu1 %2866 }
0x111a   :  { %4368 = vrcp.f32 %v2867_v30 }
0x111b   :  { %4370 = vrcp.f32 %v2185_v31 }
0x111c   :  { %4372 = vrcp.f32 %v2691_v39  ;;  %v1916_v39 = vld [vmem:[%s5120_s3 + $0x120] sm:$0xff] }
0x111d   :  { %v3033_v40 = vpop.permute.xlu1 %3032 }
0x1121   :  { %v3110_v26 = vpop.permute.xlu1 %3109 }
0x1122   :  { %4225 = vmatpush3.msra.mxu1 %v3110_v26 }
0x1123   :  { %4227 = vmatmul.mubr.msk.f32.vlgmr.msra.gmra.mxu1 %vm354_vm2, %v2192_v43  ;;  %4234 = vmatprep.subr.mxu1 %v4408_v18 }
0x1124   :  { %4236 = vmatprep.mubr.msk.f32.mxu1 %vm4409_vm1, %v4408_v18 }
0x1125   :  { %v3264_v48 = vpop.permute.xlu1 %3263 }
0x1126   :  { %4235 = vmatpush3.msra.mxu1 %v3264_v48 }
0x1127   :  { %v4369_v50 = vpop.eup %4368  ;;  %4237 = vmatmul.mubr.msk.f32.vlgmr.msra.gmra.mxu1 %vm354_vm2, %v2698_v49  ;;  %v3877_v49 = vld [vmem:[%s5121_s4 + $0xa] ss:$0 sm:$0xff] }
0x1128   :  { %v2873_v41 = vmul.f32 %v4369_v50, %v4361_v16  ;;  %v4371_v42 = vpop.eup %4370 }
0x1129   :  { %v2191_v22 = vmul.f32 %v4371_v42, %v4954_v14  ;;  %v4373_v36 = vpop.eup %4372 }
0x112a   :  { %4212 = vmatmul.mubr.msk.f32.vlgmr.msra.gmra.mxu0 %vm354_vm2, %v2873_v41  ;;  %v2697_v45 = vmul.f32 %v4373_v36, %v4359_v3  ;;  %v3878_v41 = vld [vmem:[%s5121_s4 + $0xb] ss:$0 sm:$0xff] }
0x112b   :  { %4220 = vmatpush3.msra.mxu0 %v3033_v40  ;;  %4221 = vmatprep.mubr.msk.f32.mxu0 %vm4409_vm1, %v4408_v18 }
0x112c   :  { %4229 = vmatprep.subr.mxu0 %v4408_v18 }
0x112e   :  { %4222 = vmatmul.mubr.msk.f32.vlgmr.msra.gmra.mxu0 %vm354_vm2, %v2191_v22 }
0x112f   :  { %4230 = vmatpush3.msra.mxu0 %v3187_v52  ;;  %4231 = vmatprep.mubr.msk.f32.mxu0 %vm4409_vm1, %v4408_v18  ;;  %v1904_v18 = vld [vmem:[%s5120_s3 + $0xc0] sm:$0xff] }
0x1130   :  { %4239 = vmatprep.subr.mxu0 %v1907_v53 }
0x1132   :  { %4232 = vmatmul.mubr.msk.f32.vlgmr.msra.gmra.mxu0 %vm354_vm2, %v2697_v45 }
0x1133   :  { %4240 = vmatpush3.msra.mxu0 %v1907_v53 }
0x1134   :  { %4241 = vmatprep.subr.mxu0 %v1906_v46 }
0x1135   :  { %4242 = vmatpush3.msra.mxu0 %v1906_v46  ;;  %v1915_v46 = vld [vmem:[%s5120_s3 + $0x118] sm:$0xff] }
0x1136   :  { %4243 = vmatprep.subr.mxu0 %v1905_v54 }
0x1137   :  { %4244 = vmatpush3.msra.mxu0 %v1905_v54  ;;  %v1914_v54 = vld [vmem:[%s5120_s3 + $0x110] sm:$0xff] }
0x1138   :  { %4245 = vmatprep.subr.mxu0 %v1904_v18 }
0x1139   :  { %4246 = vmatpush3.msra.mxu0 %v1904_v18  ;;  %v1913_v18 = vld [vmem:[%s5120_s3 + $0x108] sm:$0xff] }
0x113a   :  { %4261 = vmatprep.subr.mxu0 %v1919_v37 }
0x11bd   :  { %v3027_v55 = vpop.f32.mrf.mxu1 }
0x11bf   :  { %v4218_v56 = vpop.f32.mrf.mxu1 }
0x11c0   :  { %v3879_v56 = vld [vmem:[%s5121_s4 + $0xc] ss:$0 sm:$0xff] }
0x11e3   :  { %v3181_v59 = vpop.f32.mrf.mxu1 }
0x11e4   :  { %v3182_v4 = vadd.f32 %v3181_v59, %v4938_v23 }
0x11e5   :  { %v4228_v24 = vpop.f32.mrf.mxu1 }
0x11e7   :  { %v3335_v61 = vpop.f32.mrf.mxu1 }
0x11e8   :  { %v3336_v1 = vadd.f32 %v3335_v61, %v3027_v55  ;;  %v1912_v55 = vld [vmem:[%s5120_s3 + $0x100] sm:$0xff] }
0x11e9   :  { %v4238_v51 = vpop.f32.mrf.mxu1 }
0x11ea   :  { %v2950_v62 = vpop.f32.mrf.mxu0  ;;  %v3340_v58 = vadd.f32 %v3336_v1, %v3182_v4 }
0x11ec   :  { %v4213_v63 = vpop.f32.mrf.mxu0 }
0x11ee   :  { %v3104_v17 = vpop.f32.mrf.mxu0 }
0x11ef   :  { %v3105_v44 = vadd.f32 %v3104_v17, %v4936_v20  ;;  %v3882_v17 = vld [vmem:[%s5121_s4 + $0xd] ss:$0 sm:$0xff] }
0x11f0   :  { %v4223_v14 = vpop.f32.mrf.mxu0 }
0x11f2   :  { %v3258_v0 = vpop.f32.mrf.mxu0 }
0x11f3   :  { %v3259_v2 = vadd.f32 %v3258_v0, %v2950_v62 }
0x11f4   :  { %v4233_v5 = vpop.f32.mrf.mxu0 }
0x11f5   :  { %v3339_v6 = vadd.f32 %v3259_v2, %v3105_v44 }
0x11f7   :  { %4247 = vmatprep.mubr.msk.f32.mxu0 %vm94_vm0, %v3339_v6 }
0x11f8   :  { %4248 = vmatmul.mubr.msk.f32.vlgmr.msra.gmra.mxu0 %vm94_vm0, %v3340_v58 }
0x11f9   :  { %4262 = vmatpush3.msra.mxu0 %v1919_v37 }
0x11fa   :  { %4263 = vmatprep.subr.mxu0 %v1918_v13 }
0x11fb   :  { %4264 = vmatpush3.msra.mxu0 %v1918_v13 }
0x11fc   :  { %4265 = vmatprep.subr.mxu0 %v1917_v38 }
0x11fd   :  { %4266 = vmatpush3.msra.mxu0 %v1917_v38 }
0x11fe   :  { %4267 = vmatprep.subr.mxu0 %v1916_v39 }
0x11ff   :  { %4268 = vmatpush3.msra.mxu0 %v1916_v39 }
0x1200   :  { %4269 = vmatprep.subr.mxu0 %v1915_v46 }
0x1201   :  { %4270 = vmatpush3.msra.mxu0 %v1915_v46 }
0x1202   :  { %4271 = vmatprep.subr.mxu0 %v1914_v54 }
0x1203   :  { %4272 = vmatpush3.msra.mxu0 %v1914_v54 }
0x1204   :  { %4273 = vmatprep.subr.mxu0 %v1913_v18 }
0x1205   :  { %4274 = vmatpush3.msra.mxu0 %v1913_v18 }
0x1206   :  { %4275 = vmatprep.subr.mxu0 %v1912_v55 }
0x1207   :  { %4276 = vmatpush3.msra.mxu0 %v1912_v55 }
0x12b8   :  { %v4249_v10 = vpop.f32.mrf.mxu0 }
0x12b9   :  { %v3423_v9 = vadd.f32 %v4249_v10, %v3874_v7 }
0x12ba   :  { %v3417_v11 = vpop.f32.mrf.mxu0 }
0x12bb   :  { %v3418_v57 = vadd.f32 %v3874_v7, %v3417_v11  ;;  %v3427_v20 = vadd.f32 %v3423_v9, %v4825_v27 }
0x12bd   :  { %v3431_v60 = vsel %vm94_vm0, %v3427_v20, 0.0  ;;  %v3426_v23 = vadd.f32 %v3418_v57, %v4823_v25  ;;  %v1911_v25 = vld [vmem:[%s5120_s3 + $0xf8] sm:$0xff] }
0x12be   :  { %3432 = vadd.xlane.f32.xlu1 %v3431_v60  ;;  %4250 = vmatprep.subr.mxu1 %v1911_v25 }
0x12bf   :  { %v3428_v12 = vsel %vm94_vm0, %v3426_v23, 0.0  ;;  %4251 = vmatpush3.msra.mxu1 %v1911_v25 }
0x12c0   :  { %3429 = vadd.xlane.f32.xlu0 %v3428_v12  ;;  %4252 = vmatprep.subr.mxu1 %v1910_v34 }
0x12c1   :  { %4253 = vmatpush3.msra.mxu1 %v1910_v34 }
0x12c2   :  { %4254 = vmatprep.subr.mxu1 %v1909_v35 }
0x12c3   :  { %4255 = vmatpush3.msra.mxu1 %v1909_v35 }
0x12c4   :  { %4256 = vmatprep.subr.mxu1 %v1908_v32 }
0x12c5   :  { %4257 = vmatpush3.msra.mxu1 %v1908_v32  ;;  %v3885_v32 = vld [vmem:[%s5121_s4 + $0xe] ss:$0 sm:$0xff] }
0x1347   :  { %v3433_v3 = vpop.xlane.xlu1 %3432 }
0x1348   :  { %v3435_v15 = vmul.f32 0.03125, %v3433_v3  ;;  %v3681_v3 = vld [vmem:[%s5120_s3 + $0x158] sm:$0xff] }
0x1349   :  { %v3430_v16 = vpop.xlane.xlu0 %3429  ;;  %4280 = vmatprep.subr.mxu1 %v3681_v3 }
0x134a   :  { %v3434_v21 = vmul.f32 0.03125, %v3430_v16  ;;  %v3437_v8 = vsub.f32 %v3427_v20, %v3435_v15  ;;  %v3680_v15 = vld [vmem:[%s5120_s3 + $0x150] sm:$0xff]  ;;  %v3679_v16 = vld [vmem:[%s5120_s3 + $0x148] sm:$0xff] }
0x134c   :  { %v3436_v28 = vsub.f32 %v3426_v23, %v3434_v21  ;;  %v3439_v33 = vmul.f32 %v3437_v8, %v3437_v8  ;;  %v4382_v21 = vld [vmem:[%s5118_s1] sm:$0xff] }
0x134e   :  { %v3438_v29 = vmul.f32 %v3436_v28, %v3436_v28  ;;  %v3443_v27 = vsel %vm94_vm0, %v3439_v33, 0.0 }
0x1350   :  { %v3440_v31 = vsel %vm94_vm0, %v3438_v29, 0.0 }
0x1351   :  { %3441 = vadd.xlane.f32.xlu0 %v3440_v31 }
0x1355   :  { %3444 = vadd.xlane.f32.xlu0 %v3443_v27 }
0x13da   :  { %v3442_v30 = vpop.xlane.xlu0 %3441 }
0x13db   :  { %v3446_v40 = vmul.f32 0.03125, %v3442_v30  ;;  %v3886_v30 = vld [vmem:[%s5121_s4 + $0xf] ss:$0 sm:$0xff] }
0x13dd   :  { %v3448_v19 = vadd.f32 1e-05, %v3446_v40 }
0x13de   :  { %v3445_v26 = vpop.xlane.xlu0 %3444 }
0x13df   :  { %4374 = vrsqrt.f32 %v3448_v19  ;;  %v3447_v43 = vmul.f32 0.03125, %v3445_v26 }
0x13e1   :  { %v3449_v47 = vadd.f32 1e-05, %v3447_v43  ;;  %v3887_v43 = vld [vmem:[%s5121_s4 + $0x10] ss:$0 sm:$0xff] }
0x13e3   :  { %4376 = vrsqrt.f32 %v3449_v47 }
0x13ec   :  { %v4375_v48 = vpop.eup %4374 }
0x13ed   :  { %v3452_v50 = vmul.f32 %v4375_v48, %v3436_v28  ;;  %v4383_v28 = vld [vmem:[%s5118_s1 + $0x8] sm:$0xff] }
0x13ef   :  { %v3458_v42 = vmul.f32 %v3877_v49, %v3452_v50 }
0x13f0   :  { %v4377_v22 = vpop.eup %4376 }
0x13f1   :  { %v3453_v36 = vmul.f32 %v4377_v22, %v3437_v8  ;;  %v3464_v52 = vadd.f32 %v3878_v41, %v3458_v42  ;;  %v3678_v8 = vld [vmem:[%s5120_s3 + $0x140] sm:$0xff] }
0x13f3   :  { %v3459_v45 = vmul.f32 %v3877_v49, %v3453_v36  ;;  %4258 = vmatprep.mubr.msk.f32.mxu1 %vm94_vm0, %v3464_v52 }
0x13f5   :  { %v3465_v53 = vadd.f32 %v3878_v41, %v3459_v45 }
0x13f7   :  { %4259 = vmatmul.mubr.msk.f32.vlgmr.msra.gmra.mxu1 %vm94_vm0, %v3465_v53 }
0x13f8   :  { %4281 = vmatpush3.msra.mxu1 %v3681_v3 }
0x13f9   :  { %4282 = vmatprep.subr.mxu1 %v3680_v15 }
0x13fa   :  { %4283 = vmatpush3.msra.mxu1 %v3680_v15 }
0x13fb   :  { %4284 = vmatprep.subr.mxu1 %v3679_v16 }
0x13fc   :  { %4285 = vmatpush3.msra.mxu1 %v3679_v16 }
0x13fd   :  { %4286 = vmatprep.subr.mxu1 %v3678_v8 }
0x13fe   :  { %4287 = vmatpush3.msra.mxu1 %v3678_v8 }
0x14b7   :  { %v4260_v59 = vpop.f32.mrf.mxu1 }
0x14b8   :  { %v3548_v24 = vadd.f32 %v4260_v59, %v3879_v56 }
0x14b9   :  { %v3542_v61 = vpop.f32.mrf.mxu1 }
0x14ba   :  { %v3543_v51 = vadd.f32 %v3879_v56, %v3542_v61  ;;  %v3552_v63 = vmax.f32 %v3548_v24, 0.0 }
0x14bc   :  { %v3551_v62 = vmax.f32 %v3543_v51, 0.0 }
0x14be   :  { %4277 = vmatprep.mubr.msk.f32.mxu0 %vm1778_vm3, %v3551_v62 }
0x14bf   :  { %4278 = vmatmul.mubr.msk.f32.vlgmr.msra.gmra.mxu0 %vm1778_vm3, %v3552_v63 }
0x157f   :  { %v4279_v14 = vpop.f32.mrf.mxu0 }
0x1580   :  { %v3635_v1 = vadd.f32 %v4279_v14, %v3882_v17 }
0x1581   :  { %v3629_v0 = vpop.f32.mrf.mxu0 }
0x1582   :  { %v3630_v44 = vadd.f32 %v3882_v17, %v3629_v0  ;;  %v3639_v2 = vadd.f32 %v3635_v1, %v3465_v53 }
0x1584   :  { %v3643_v4 = vsel %vm94_vm0, %v3639_v2, 0.0  ;;  %v3638_v5 = vadd.f32 %v3630_v44, %v3464_v52 }
0x1585   :  { %3644 = vadd.xlane.f32.xlu0 %v3643_v4 }
0x1586   :  { %v3640_v6 = vsel %vm94_vm0, %v3638_v5, 0.0 }
0x1587   :  { %3641 = vadd.xlane.f32.xlu1 %v3640_v6 }
0x160e   :  { %v3645_v58 = vpop.xlane.xlu0 %3644 }
0x160f   :  { %v3647_v7 = vmul.f32 0.03125, %v3645_v58 }
0x1610   :  { %v3642_v10 = vpop.xlane.xlu1 %3641 }
0x1611   :  { %v3649_v9 = vsub.f32 %v3639_v2, %v3647_v7  ;;  %v3646_v11 = vmul.f32 0.03125, %v3642_v10 }
0x1613   :  { %v3648_v57 = vsub.f32 %v3638_v5, %v3646_v11  ;;  %v3651_v20 = vmul.f32 %v3649_v9, %v3649_v9 }
0x1615   :  { %v3655_v60 = vsel %vm94_vm0, %v3651_v20, 0.0  ;;  %v3650_v23 = vmul.f32 %v3648_v57, %v3648_v57 }
0x1616   :  { %3656 = vadd.xlane.f32.xlu0 %v3655_v60 }
0x1617   :  { %v3652_v12 = vsel %vm94_vm0, %v3650_v23, 0.0 }
0x1618   :  { %3653 = vadd.xlane.f32.xlu1 %v3652_v12 }
0x1629   :  { %3770 = vperm.xlu1 %4301, %v4382_v21  }
0x162c   :  { %3775 = vperm.xlu0 %4300, %v4383_v28  }
0x169f   :  { %v3657_v29 = vpop.xlane.xlu0 %3656 }
0x16a0   :  { %v3659_v31 = vmul.f32 0.03125, %v3657_v29 }
0x16a1   :  { %v3654_v33 = vpop.xlane.xlu1 %3653 }
0x16a2   :  { %v3661_v27 = vadd.f32 1e-05, %v3659_v31  ;;  %v3658_v25 = vmul.f32 0.03125, %v3654_v33 }
0x16a4   :  { %4378 = vrsqrt.f32 %v3661_v27  ;;  %v3660_v34 = vadd.f32 1e-05, %v3658_v25 }
0x16a5   :  { %v3771_v41 = vpop.permute.xlu1 %3770 }
0x16a6   :  { %4380 = vrsqrt.f32 %v3660_v34 }
0x16a7   :  { %v3776_v48 = vpop.permute.xlu0 %3775 }
0x16b1   :  { %v4379_v35 = vpop.eup %4378 }
0x16b2   :  { %v3665_v37 = vmul.f32 %v4379_v35, %v3649_v9 }
0x16b3   :  { %v4381_v13 = vpop.eup %4380 }
0x16b4   :  { %v3664_v38 = vmul.f32 %v4381_v13, %v3648_v57  ;;  %v3671_v39 = vmul.f32 %v3885_v32, %v3665_v37 }
0x16b6   :  { %v3670_v40 = vmul.f32 %v3885_v32, %v3664_v38  ;;  %v3677_v26 = vadd.f32 %v3886_v30, %v3671_v39 }
0x16b8   :  { %v3676_v19 = vadd.f32 %v3886_v30, %v3670_v40 }
0x16ba   :  { %4288 = vmatprep.mubr.msk.f32.mxu1 %vm94_vm0, %v3676_v19 }
0x16bb   :  { %4289 = vmatmul.mubr.msk.f32.vlgmr.msra.gmra.mxu1 %vm94_vm0, %v3677_v26 }
0x177b   :  { %v4290_v47 = vpop.f32.mrf.mxu1 }
0x177c   :  { %v3765_v49 = vadd.f32 %v4290_v47, %v3887_v43 }
0x177d   :  { %v3759_v50 = vpop.f32.mrf.mxu1 }
0x177e   :  { %v3779_v42 = vmul.f32 %v3776_v48, %v3765_v49  ;;  %v3760_v22 = vadd.f32 %v3887_v43, %v3759_v50 }
0x1780   :  { %3782 = vst.msk [vmem:[#allocation2 + $0x8] sm:$0xff] %vm3780_vm4, %v3779_v42  ;;  %v3778_v36 = vmul.f32 %v3771_v41, %v3760_v22 }
0x1782   :  { %3781 = vst.msk [vmem:[#allocation2] sm:$0xff] %vm3780_vm4, %v3778_v36 }
0x1783   :  { %4395 = shalt.err (!%p4392_p4)
}
0x1784   :  { %s4413_s4 = smov 128   ;;  %s4414_s12 = smov 8  }
0x1785   :  { %3794 = dma.vmem_to_hbm [thread:$0]  %s3789_s10, 256, %s5122_s5, [#allocation3], %s4413_s4, %s4413_s4, %s4414_s12  }
0x1786   :  { %4404 = dma.done.wait [#allocation3], 256  }
0x1787   :  { %4405 = vsyncadd [#allocation3], 4294967040 }
0x1788   :  { %3798 = vsyncpa [#allocation3], 1 }

</bundles_post_ra>
